<compile_context>
chip_gen: v6e
topology: v6e:2x2x1
jax: 0.10.0
libtpu: 0.0.40
codegen_flags: <defaults>
</compile_context>

<pallas_src>
import functools
import math

import jax
import jax.numpy as jnp
from jax.experimental import pallas as pl
from jax.experimental.pallas import tpu as pltpu


def _round_up(x, m):
    return (x + m - 1) // m * m


def _cdiv(a, b):
    return (a + b - 1) // b


def _mlp_kernel(x_ref, w1_ref, b1_ref, w2_ref, b2_ref, w3_ref, b3_ref, o_ref):
    # x arrives fp32; cast to bf16 in-kernel (VPU work hidden under the
    # layer-1 matmul) so the wrapper never materializes a bf16 copy in HBM.
    x = x_ref[...].astype(jnp.bfloat16)
    # Layer 1: bf16 x bf16 MXU matmul -> fp32 accumulator; bias + ReLU in fp32.
    h1 = jnp.dot(x, w1_ref[...], preferred_element_type=jnp.float32)
    h1 = jnp.maximum(h1 + b1_ref[...], 0.0).astype(jnp.bfloat16)
    # Layer 2: same pattern.
    h2 = jnp.dot(h1, w2_ref[...], preferred_element_type=jnp.float32)
    h2 = jnp.maximum(h2 + b2_ref[...], 0.0).astype(jnp.bfloat16)
    # Layer 3: Linear only (output columns lane-padded to 128).
    o = jnp.dot(h2, w3_ref[...], preferred_element_type=jnp.float32)
    o_ref[...] = (o + b3_ref[...]).astype(o_ref.dtype)


def _pick_batch_tile(B, max_batch_tile):
    """Batch tile: multiple of 16 (bf16 sublane packing), no pathological
    padding, and >= 2 grid steps for large batches so the 'parallel' axis can
    shard across both TensorCores on v7x."""
    n_tiles = _cdiv(B, max_batch_tile)
    if n_tiles == 1 and B >= 256:
        n_tiles = 2
    tm = _round_up(_cdiv(B, n_tiles), 16)
    Bp = _round_up(B, tm)
    return tm, Bp


@functools.partial(jax.jit, static_argnames=("out_dim", "max_batch_tile"))
def encoder_colormnist_forward(x, kernel_params, *, out_dim, max_batch_tile=512):
    """x: (B, n_cin, n_hw, n_hw) float32.  Returns (B, out_dim, 1, 1) float32.

    `kernel_params` must come from `prepare_params` (bf16 weights stored
    (in, out), fp32 biases (1, out), final layer padded to a multiple of 128).
    """
    w1, b1, w2, b2, w3, b3 = kernel_params
    B = x.shape[0]
    in_dim = w1.shape[0]
    h1_dim = w1.shape[1]
    h2_dim = w2.shape[1]
    out_p = w3.shape[1]

    # Flatten NCHW -> (B, in_dim); stays fp32 (cast to bf16 inside the kernel).
    x2d = x.reshape(B, -1).astype(jnp.float32)

    tm, Bp = _pick_batch_tile(B, max_batch_tile)
    if Bp != B:
        x2d = jnp.pad(x2d, ((0, Bp - B), (0, 0)))

    grid = (Bp // tm,)

    flops = 2 * B * (in_dim * h1_dim + h1_dim * h2_dim + h2_dim * out_dim)
    bytes_accessed = (
        B * in_dim * 4                               # fp32 activations in
        + (w1.size + w2.size + w3.size) * 2          # bf16 weights
        + (b1.size + b2.size + b3.size) * 4          # fp32 biases
        + B * out_p * 4                              # fp32 output
    )

    out2d = pl.pallas_call(
        _mlp_kernel,
        out_shape=jax.ShapeDtypeStruct((Bp, out_p), jnp.float32),
        grid_spec=pltpu.PrefetchScalarGridSpec(
            num_scalar_prefetch=0,
            grid=grid,
            in_specs=[
                pl.BlockSpec((tm, in_dim), lambda i: (i, 0)),      # x tile
                pl.BlockSpec((in_dim, h1_dim), lambda i: (0, 0)),  # w1 (resident)
                pl.BlockSpec((1, h1_dim), lambda i: (0, 0)),       # b1
                pl.BlockSpec((h1_dim, h2_dim), lambda i: (0, 0)),  # w2 (resident)
                pl.BlockSpec((1, h2_dim), lambda i: (0, 0)),       # b2
                pl.BlockSpec((h2_dim, out_p), lambda i: (0, 0)),   # w3 (resident)
                pl.BlockSpec((1, out_p), lambda i: (0, 0)),        # b3
            ],
            out_specs=pl.BlockSpec((tm, out_p), lambda i: (i, 0)),
        ),
        compiler_params=pltpu.CompilerParams(
            dimension_semantics=("parallel",),
        ),
        cost_estimate=pl.CostEstimate(
            flops=flops, transcendentals=0, bytes_accessed=bytes_accessed),
    )(x2d, w1, b1, w2, b2, w3, b3)

    # Drop batch / lane padding and restore the (B, out_dim, 1, 1) shape.
    return out2d[:B, :out_dim].reshape(B, out_dim, 1, 1)


def init_params(key, n_cin, n_hw, s_dim):
    """Deterministic synthetic fp32 init matching nn.Linear shapes.

    PyTorch nn.Linear(in, out) has weight (out, in), bias (out,).
    We store weights as (in, out) (transposed) and biases as (1, out)."""
    in_dim = n_cin * n_hw * n_hw
    dims = [(in_dim, 1024), (1024, 256), (256, s_dim * 2)]
    params = []
    for (din, dout) in dims:
        key, kw, kb = jax.random.split(key, 3)
        bound = 1.0 / math.sqrt(din)  # PyTorch default U(-1/sqrt(in), 1/sqrt(in))
        w = jax.random.uniform(kw, (din, dout), jnp.float32, -bound, bound)
        b = jax.random.uniform(kb, (1, dout), jnp.float32, -bound, bound)
        params += [w, b]
    return tuple(params)


def prepare_params(params, *, lane_pad=128):
    """One-time (out-of-forward) preprocessing: bf16 weights, fp32 biases,
    final layer zero-padded to a lane-dense multiple of 128 output features.
    Returns (kernel_params, out_dim)."""
    w1, b1, w2, b2, w3, b3 = params
    out_dim = w3.shape[1]
    out_p = _round_up(out_dim, lane_pad)
    w3p = jnp.pad(w3, ((0, 0), (0, out_p - out_dim)))
    b3p = jnp.pad(b3, ((0, 0), (0, out_p - out_dim)))
    kernel_params = (
        w1.astype(jnp.bfloat16), b1.astype(jnp.float32),
        w2.astype(jnp.bfloat16), b2.astype(jnp.float32),
        w3p.astype(jnp.bfloat16), b3p.astype(jnp.float32),
    )
    return jax.tree_util.tree_map(jnp.asarray, kernel_params), out_dim


def _ref_forward(x, params):
    """Plain-JAX reference replicating the kernel's bf16/fp32 mixed precision."""
    w1, b1, w2, b2, w3, b3 = params
    bf = lambda a: a.astype(jnp.bfloat16)
    x2d = bf(x.reshape(x.shape[0], -1))
    h1 = jnp.maximum(
        jnp.dot(x2d, bf(w1), preferred_element_type=jnp.float32) + b1, 0.0)
    h2 = jnp.maximum(
        jnp.dot(bf(h1), bf(w2), preferred_element_type=jnp.float32) + b2, 0.0)
    o = jnp.dot(bf(h2), bf(w3), preferred_element_type=jnp.float32) + b3
    return o.reshape(x.shape[0], -1, 1, 1)


if __name__ == "__main__":
    # Small shapes consistent with the module: ColorMNIST-like input.
    B, n_cin, n_hw, s_dim = 2, 3, 16, 16  # in_dim = 768, out = 2*s_dim = 32

    key = jax.random.PRNGKey(0)
    key, kx = jax.random.split(key)
    x = jax.random.normal(kx, (B, n_cin, n_hw, n_hw), jnp.float32)  # NCHW

    params = init_params(key, n_cin, n_hw, s_dim)
    kernel_params, out_dim = prepare_params(params)   # one-time prep, not per call

    out = encoder_colormnist_forward(x, kernel_params, out_dim=out_dim)
    jax.block_until_ready(out)

    # Sanity check against a plain-JAX reference of the same mixed-precision math.
    ref = _ref_forward(x, params)
    assert out.shape == (B, 2 * s_dim, 1, 1)
    assert jnp.allclose(out, ref, atol=2e-2, rtol=2e-2), (
        float(jnp.max(jnp.abs(out - ref))))

    print("KERNEL_OK")
</pallas_src>

<mosaic_0001>
module attributes {stable_mosaic.version = 11 : i64} {
  func.func @_mlp_kernel(%arg0: i32, %arg1: memref<16x768xf32, #tpu.memory_space<vmem>>, %arg2: memref<768x1024xbf16, #tpu.memory_space<vmem>>, %arg3: memref<1x1024xf32, #tpu.memory_space<vmem>>, %arg4: memref<1024x256xbf16, #tpu.memory_space<vmem>>, %arg5: memref<1x256xf32, #tpu.memory_space<vmem>>, %arg6: memref<256x128xbf16, #tpu.memory_space<vmem>>, %arg7: memref<1x128xf32, #tpu.memory_space<vmem>>, %arg8: memref<16x128xf32, #tpu.memory_space<vmem>>) attributes {dimension_semantics = [#tpu.dimension_semantics<parallel>], iteration_bounds = array<i64: 1>, scalar_prefetch = 0 : i64, scratch_operands = 0 : i64, tpu.core_type = #tpu.core_type<tc>, window_params = [{transform_indices = @transform_0, window_bounds = array<i64: 16, 768>}, {pipeline_mode = #tpu.pipeline_mode<synchronous>, transform_indices = @transform_1, window_bounds = array<i64: 768, 1024>}, {pipeline_mode = #tpu.pipeline_mode<synchronous>, transform_indices = @transform_2, window_bounds = array<i64: 1, 1024>}, {pipeline_mode = #tpu.pipeline_mode<synchronous>, transform_indices = @transform_3, window_bounds = array<i64: 1024, 256>}, {pipeline_mode = #tpu.pipeline_mode<synchronous>, transform_indices = @transform_4, window_bounds = array<i64: 1, 256>}, {pipeline_mode = #tpu.pipeline_mode<synchronous>, transform_indices = @transform_5, window_bounds = array<i64: 256, 128>}, {pipeline_mode = #tpu.pipeline_mode<synchronous>, transform_indices = @transform_6, window_bounds = array<i64: 1, 128>}, {transform_indices = @transform_7, window_bounds = array<i64: 16, 128>}]} {
    %c0 = arith.constant 0 : index
    %c0_0 = arith.constant 0 : index
    %0 = vector.load %arg1[%c0, %c0_0] : memref<16x768xf32, #tpu.memory_space<vmem>>, vector<16x768xf32>
    %1 = arith.truncf %0 : vector<16x768xf32> to vector<16x768xbf16>
    %c0_1 = arith.constant 0 : index
    %c0_2 = arith.constant 0 : index
    %2 = vector.load %arg2[%c0_1, %c0_2] : memref<768x1024xbf16, #tpu.memory_space<vmem>>, vector<768x1024xbf16>
    %cst = arith.constant dense<0.000000e+00> : vector<16x1024xf32>
    %3 = tpu.matmul %1, %2, %cst {dimension_numbers = #tpu.dot_dimension_numbers<[1], [0], [0], [1], [0, 0, 1, 1], [], []>} : vector<16x768xbf16>, vector<768x1024xbf16>, vector<16x1024xf32> -> vector<16x1024xf32>
    %c0_3 = arith.constant 0 : index
    %c0_4 = arith.constant 0 : index
    %4 = vector.load %arg3[%c0_3, %c0_4] : memref<1x1024xf32, #tpu.memory_space<vmem>>, vector<1x1024xf32>
    %5 = vector.broadcast %4 : vector<1x1024xf32> to vector<16x1024xf32>
    %6 = arith.addf %3, %5 : vector<16x1024xf32>
    %cst_5 = arith.constant 0.000000e+00 : f32
    %7 = vector.broadcast %cst_5 : f32 to vector<16x1024xf32>
    %8 = arith.maximumf %6, %7 : vector<16x1024xf32>
    %9 = arith.truncf %8 : vector<16x1024xf32> to vector<16x1024xbf16>
    %c0_6 = arith.constant 0 : index
    %c0_7 = arith.constant 0 : index
    %10 = vector.load %arg4[%c0_6, %c0_7] : memref<1024x256xbf16, #tpu.memory_space<vmem>>, vector<1024x256xbf16>
    %cst_8 = arith.constant dense<0.000000e+00> : vector<16x256xf32>
    %11 = tpu.matmul %9, %10, %cst_8 {dimension_numbers = #tpu.dot_dimension_numbers<[1], [0], [0], [1], [0, 0, 1, 1], [], []>} : vector<16x1024xbf16>, vector<1024x256xbf16>, vector<16x256xf32> -> vector<16x256xf32>
    %c0_9 = arith.constant 0 : index
    %c0_10 = arith.constant 0 : index
    %12 = vector.load %arg5[%c0_9, %c0_10] : memref<1x256xf32, #tpu.memory_space<vmem>>, vector<1x256xf32>
    %13 = vector.broadcast %12 : vector<1x256xf32> to vector<16x256xf32>
    %14 = arith.addf %11, %13 : vector<16x256xf32>
    %cst_11 = arith.constant 0.000000e+00 : f32
    %15 = vector.broadcast %cst_11 : f32 to vector<16x256xf32>
    %16 = arith.maximumf %14, %15 : vector<16x256xf32>
    %17 = arith.truncf %16 : vector<16x256xf32> to vector<16x256xbf16>
    %c0_12 = arith.constant 0 : index
    %c0_13 = arith.constant 0 : index
    %18 = vector.load %arg6[%c0_12, %c0_13] : memref<256x128xbf16, #tpu.memory_space<vmem>>, vector<256x128xbf16>
    %cst_14 = arith.constant dense<0.000000e+00> : vector<16x128xf32>
    %19 = tpu.matmul %17, %18, %cst_14 {dimension_numbers = #tpu.dot_dimension_numbers<[1], [0], [0], [1], [0, 0, 1, 1], [], []>} : vector<16x256xbf16>, vector<256x128xbf16>, vector<16x128xf32> -> vector<16x128xf32>
    %c0_15 = arith.constant 0 : index
    %c0_16 = arith.constant 0 : index
    %20 = vector.load %arg7[%c0_15, %c0_16] : memref<1x128xf32, #tpu.memory_space<vmem>>, vector<1x128xf32>
    %21 = vector.broadcast %20 : vector<1x128xf32> to vector<16x128xf32>
    %22 = arith.addf %19, %21 : vector<16x128xf32>
    %c0_17 = arith.constant 0 : index
    %c0_18 = arith.constant 0 : index
    %23 = vector.load %arg8[%c0_17, %c0_18] : memref<16x128xf32, #tpu.memory_space<vmem>>, vector<16x128xf32>
    tpu.vector_store %arg8[%c0_17, %c0_18], %22 {strides = array<i32>} : memref<16x128xf32, #tpu.memory_space<vmem>>, vector<16x128xf32>,
    return
  }
  func.func @transform_0(%arg0: i32) -> (i32, i32) {
    %c0_i32 = arith.constant 0 : i32
    %c0_i32_0 = arith.constant 0 : i32
    return %arg0, %c0_i32 : i32, i32
  }
  func.func @transform_1(%arg0: i32) -> (i32, i32) {
    %c0_i32 = arith.constant 0 : i32
    %c0_i32_0 = arith.constant 0 : i32
    %c0_i32_1 = arith.constant 0 : i32
    return %c0_i32, %c0_i32_0 : i32, i32
  }
  func.func @transform_2(%arg0: i32) -> (i32, i32) {
    %c0_i32 = arith.constant 0 : i32
    %c0_i32_0 = arith.constant 0 : i32
    %c0_i32_1 = arith.constant 0 : i32
    return %c0_i32, %c0_i32_0 : i32, i32
  }
  func.func @transform_3(%arg0: i32) -> (i32, i32) {
    %c0_i32 = arith.constant 0 : i32
    %c0_i32_0 = arith.constant 0 : i32
    %c0_i32_1 = arith.constant 0 : i32
    return %c0_i32, %c0_i32_0 : i32, i32
  }
  func.func @transform_4(%arg0: i32) -> (i32, i32) {
    %c0_i32 = arith.constant 0 : i32
    %c0_i32_0 = arith.constant 0 : i32
    %c0_i32_1 = arith.constant 0 : i32
    return %c0_i32, %c0_i32_0 : i32, i32
  }
  func.func @transform_5(%arg0: i32) -> (i32, i32) {
    %c0_i32 = arith.constant 0 : i32
    %c0_i32_0 = arith.constant 0 : i32
    %c0_i32_1 = arith.constant 0 : i32
    return %c0_i32, %c0_i32_0 : i32, i32
  }
  func.func @transform_6(%arg0: i32) -> (i32, i32) {
    %c0_i32 = arith.constant 0 : i32
    %c0_i32_0 = arith.constant 0 : i32
    %c0_i32_1 = arith.constant 0 : i32
    return %c0_i32, %c0_i32_0 : i32, i32
  }
  func.func @transform_7(%arg0: i32) -> (i32, i32) {
    %c0_i32 = arith.constant 0 : i32
    %c0_i32_0 = arith.constant 0 : i32
    return %arg0, %c0_i32 : i32, i32
  }
}

</mosaic_0001>

<bundles_post_ra>
// kernel: encoder_colormnist_forward.1
= control target key start
LH: loop header
LB: loop body
LE: loop exit
PB: predicated region body
PF: predicated region fallthrough
CT: control target
= control target key end

     0   :  { %12 = vsyncpa [#allocation3], 0  ;;  %s5268_s0 = inlined_call_operand.vmem [shape: f32[16,768], index: 0, kind: input, shape index: {}]   ;;  %s5269_s1 = inlined_call_operand.hbm [shape: bf16[768,1024], index: 1, kind: input, shape index: {}]   ;;  %s5270_s2 = inlined_call_operand.hbm [shape: f32[1,1024], index: 2, kind: input, shape index: {}]   ;;  %s5271_s3 = inlined_call_operand.hbm [shape: bf16[1024,256], index: 3, kind: input, shape index: {}]   ;;  %s5272_s4 = inlined_call_operand.hbm [shape: f32[1,256], index: 4, kind: input, shape index: {}]   ;;  %s5273_s5 = inlined_call_operand.hbm [shape: bf16[256,128], index: 5, kind: input, shape index: {}]   ;;  %s5274_s6 = inlined_call_operand.hbm [shape: f32[1,128], index: 6, kind: input, shape index: {}]   ;;  %s5275_s7 = inlined_call_operand.vmem [shape: f32[16,128], index: 7, kind: output, shape index: {}]  }
   0x1   :  { %13 = vsyncpa [#allocation5], 0 }
   0x2   :  { %14 = vsyncpa [#allocation8], 0 }
   0x3   :  { %15 = vsyncpa [#allocation11], 0  ;;  %s5051_s24 = smov [#allocation4]   ;;  %s5052_s26 = smov [#allocation7]  }
   0x4   :  { %s36_s25 = sshll.u32 %s5051_s24, 4  ;;  %s58_s27 = sshll.u32 %s5052_s26, 4  ;;  %s37_s25 = int_to_ptr.vmem [resolvable:$true] %s36_s25  ;;  %s59_s27 = int_to_ptr.vmem [resolvable:$true] %s58_s27 }
   0x5   :  { %s4931_s28 = scalar_lea.vmem %s37_s25, 128  ;;  %p4936_p1 = scmp.lt.s32.totalorder %s37_s25, %s37_s25 }
   0x6   :  { %p4932_p0 = scmp.ne.s32.totalorder %s37_s25, %s4931_s28  ;;  %p4937_p2 = scmp.lt.s32.totalorder %s4931_s28, %s4931_s28 }
   0x8   :  { %p4938_p3 = por %p4937_p2, %p4936_p1 }
   0xa   :  { %p4939_p4 = pnand %p4938_p3, %p4932_p0 }
   0xc   :  { %4942 = shalt.err (!%p4939_p4)
}
   0xd   :  { %39 = dma.hbm_to_vmem [thread:$0]  %s5270_s2, 128, %s37_s25, [#allocation5]  }
   0xe   :  { %s4951_s8 = scalar_lea.vmem %s59_s27, 32  ;;  %p4956_p6 = scmp.lt.s32.totalorder %s59_s27, %s59_s27 }
   0xf   :  { %p4952_p5 = scmp.ne.s32.totalorder %s59_s27, %s4951_s8  ;;  %p4957_p7 = scmp.lt.s32.totalorder %s4951_s8, %s4951_s8 }
  0x11   :  { %p4958_p8 = por %p4957_p7, %p4956_p6 }
  0x13   :  { %p4959_p9 = pnand %p4958_p8, %p4952_p5 }
  0x15   :  { %4962 = shalt.err (!%p4959_p9)
}
  0x16   :  { %61 = dma.hbm_to_vmem [thread:$0]  %s5272_s4, 32, %s59_s27, [#allocation8]  }
  0x17   :  { %s5053_s11 = smov [#allocation2]  }
  0x18   :  { %s23_s12 = sshll.u32 %s5053_s11, 4  ;;  %s24_s12 = int_to_ptr.vmem [resolvable:$true] %s23_s12 }
  0x19   :  { %s4971_s13 = scalar_lea.vmem %s24_s12, 49152  ;;  %p4976_p11 = scmp.lt.s32.totalorder %s24_s12, %s24_s12 }
  0x1a   :  { %p4972_p10 = scmp.ne.s32.totalorder %s24_s12, %s4971_s13  ;;  %p4977_p12 = scmp.lt.s32.totalorder %s4971_s13, %s4971_s13 }
  0x1c   :  { %p4978_p13 = por %p4977_p12, %p4976_p11 }
  0x1e   :  { %p4979_p0 = pnand %p4978_p13, %p4972_p10 }
  0x20   :  { %4982 = shalt.err (!%p4979_p0)
}
  0x21   :  { %s5054_s2 = smov 512   ;;  %s5055_s14 = smov 32  }
  0x22   :  { %29 = dma.hbm_to_vmem [thread:$0]  %s5269_s1, 49152, %s24_s12, [#allocation3], %s5054_s2, %s5054_s2, %s5055_s14  }
  0x23   :  { %s5056_s17 = smov [#allocation6]  }
  0x24   :  { %s45_s18 = sshll.u32 %s5056_s17, 4  ;;  %s46_s18 = int_to_ptr.vmem [resolvable:$true] %s45_s18 }
  0x25   :  { %s4991_s4 = scalar_lea.vmem %s46_s18, 16384  ;;  %p4996_p2 = scmp.lt.s32.totalorder %s46_s18, %s46_s18 }
  0x26   :  { %p4992_p1 = scmp.ne.s32.totalorder %s46_s18, %s4991_s4  ;;  %p4997_p3 = scmp.lt.s32.totalorder %s4991_s4, %s4991_s4 }
  0x28   :  { %p4998_p4 = por %p4997_p3, %p4996_p2 }
  0x2a   :  { %p4999_p5 = pnand %p4998_p4, %p4992_p1 }
  0x2c   :  { %5002 = shalt.err (!%p4999_p5)
}
  0x2d   :  { %s5057_s19 = smov 128   ;;  %s5058_s20 = smov 8  }
  0x2e   :  { %51 = dma.hbm_to_vmem [thread:$0]  %s5271_s3, 16384, %s46_s18, [#allocation5], %s5057_s19, %s5057_s19, %s5058_s20  }
  0x2f   :  { %s5059_s23 = smov [#allocation9]  }
  0x30   :  { %s67_s24 = sshll.u32 %s5059_s23, 4  ;;  %s68_s24 = int_to_ptr.vmem [resolvable:$true] %s67_s24 }
  0x31   :  { %s5011_s1 = scalar_lea.vmem %s68_s24, 2048  ;;  %p5016_p7 = scmp.lt.s32.totalorder %s68_s24, %s68_s24 }
  0x32   :  { %p5012_p6 = scmp.ne.s32.totalorder %s68_s24, %s5011_s1  ;;  %p5017_p8 = scmp.lt.s32.totalorder %s5011_s1, %s5011_s1 }
  0x34   :  { %p5018_p9 = por %p5017_p8, %p5016_p7 }
  0x36   :  { %p5019_p10 = pnand %p5018_p9, %p5012_p6 }
  0x38   :  { %5022 = shalt.err (!%p5019_p10)
}
  0x39   :  { %s5060_s25 = smov 64   ;;  %s5061_s26 = smov 4  }
  0x3a   :  { %73 = dma.hbm_to_vmem [thread:$0]  %s5273_s5, 2048, %s68_s24, [#allocation8], %s5060_s25, %s5060_s25, %s5061_s26  }
  0x3b   :  { %s5062_s29 = smov [#allocation10]  }
  0x3c   :  { %s80_s30 = sshll.u32 %s5062_s29, 4  ;;  %s81_s30 = int_to_ptr.vmem [resolvable:$true] %s80_s30 }
  0x3d   :  { %s5031_s3 = scalar_lea.vmem %s81_s30, 16  ;;  %s5035_s8 = scalar_lea.vmem %s81_s30, 32 }
  0x3e   :  { %p5032_p11 = scmp.ne.s32.totalorder %s81_s30, %s5031_s3  ;;  %p5036_p12 = scmp.lt.s32.totalorder %s81_s30, %s81_s30 }
  0x3f   :  { %p5037_p13 = scmp.lt.s32.totalorder %s5035_s8, %s5031_s3 }
  0x41   :  { %p5038_p0 = por %p5037_p13, %p5036_p12 }
  0x43   :  { %p5039_p1 = pnand %p5038_p0, %p5032_p11 }
  0x45   :  { %5042 = shalt.err (!%p5039_p1)
}
  0x46   :  { %83 = dma.hbm_to_vmem [thread:$0]  %s5274_s6, 16, %s81_s30, [#allocation11]  }
  0x47   :  { %5043 = dma.done.wait [#allocation3], 49152  }
  0x48   :  { %5044 = vsyncadd [#allocation3], 4294918144 }
  0x49   :  { %5045 = dma.done.wait [#allocation5], 16512  }
  0x4a   :  { %5046 = vsyncadd [#allocation5], 4294950784 }
  0x4b   :  { %5047 = dma.done.wait [#allocation8], 2080  }
  0x4c   :  { %5048 = vsyncadd [#allocation8], 4294965216 }
  0x4d   :  { %5049 = dma.done.wait [#allocation11], 16  }
  0x4e   :  { %5050 = vsyncadd [#allocation11], 4294967280  ;;  %v177_v0 = vld [vmem:[#allocation2 + $0x1c0] sm:$0xff]  ;;  %v104_v54 = vld [vmem:[%s5268_s0 + $0x8] sm:$0xff] }
  0x4f   :  { %v181_v1 = vld [vmem:[#allocation2 + $0x1e0] sm:$0xff]  ;;  %v110_v55 = vld [vmem:[%s5268_s0 + $0x38] sm:$0xff]  ;;  %v112_v60 = vld [vmem:[%s5268_s0 + $0x48] sm:$0xff] }
  0x50   :  { %v305_v2 = vld [vmem:[#allocation2 + $0x5c0] sm:$0xff]  ;;  %v4208_v3 = vcombine.high %v177_v0, %v181_v1  ;;  %v4207_v5 = vcombine.low %v177_v0, %v181_v1  ;;  %v5127_v58 = vpack.c.bf16 %v110_v55, %v104_v54  ;;  %v106_v59 = vld [vmem:[%s5268_s0 + $0x18] sm:$0xff] }
  0x51   :  { %v309_v4 = vld [vmem:[#allocation2 + $0x5e0] sm:$0xff]  ;;  %v5135_v63 = vpack.c.bf16 %v112_v60, %v106_v59 }
  0x52   :  { %v169_v6 = vld [vmem:[#allocation2 + $0x180] sm:$0xff]  ;;  %v4336_v8 = vcombine.high %v305_v2, %v309_v4  ;;  %v4335_v9 = vcombine.low %v305_v2, %v309_v4  ;;  %2467 = vmatprep.subr.bf16.mxu0 %v4208_v3  ;;  %2499 = vmatprep.mubr.bf16.mxu0 %v5127_v58 }
  0x53   :  { %v173_v7 = vld [vmem:[#allocation2 + $0x1a0] sm:$0xff]  ;;  %2468 = vmatpush1.bf16.msra.mxu0 %v4207_v5  ;;  %2542 = vmatprep.mubr.bf16.mxu1 %v5135_v63 }
  0x54   :  { %v4200_v10 = vcombine.high %v169_v6, %v173_v7  ;;  %v297_v11 = vld [vmem:[#allocation2 + $0x580] sm:$0xff]  ;;  %2510 = vmatprep.subr.bf16.mxu1 %v4336_v8  ;;  %v4199_v18 = vcombine.low %v169_v6, %v173_v7 }
  0x55   :  { %v301_v12 = vld [vmem:[#allocation2 + $0x5a0] sm:$0xff]  ;;  %2511 = vmatpush1.bf16.msra.mxu1 %v4335_v9 }
  0x56   :  { %v161_v13 = vld [vmem:[#allocation2 + $0x140] sm:$0xff]  ;;  %v4328_v14 = vcombine.high %v297_v11, %v301_v12  ;;  %2469 = vmatprep.subr.bf16.mxu0 %v4200_v10  ;;  %v4327_v19 = vcombine.low %v297_v11, %v301_v12 }
  0x57   :  { %v165_v15 = vld [vmem:[#allocation2 + $0x160] sm:$0xff]  ;;  %2470 = vmatpush1.bf16.msra.mxu0 %v4199_v18 }
  0x58   :  { %v289_v16 = vld [vmem:[#allocation2 + $0x540] sm:$0xff]  ;;  %v4192_v20 = vcombine.high %v161_v13, %v165_v15  ;;  %2512 = vmatprep.subr.bf16.mxu1 %v4328_v14  ;;  %v4191_v26 = vcombine.low %v161_v13, %v165_v15 }
  0x59   :  { %v293_v17 = vld [vmem:[#allocation2 + $0x560] sm:$0xff]  ;;  %2513 = vmatpush1.bf16.msra.mxu1 %v4327_v19 }
  0x5a   :  { %v4320_v21 = vcombine.high %v289_v16, %v293_v17  ;;  %v153_v22 = vld [vmem:[#allocation2 + $0x100] sm:$0xff]  ;;  %2471 = vmatprep.subr.bf16.mxu0 %v4192_v20  ;;  %v4319_v27 = vcombine.low %v289_v16, %v293_v17 }
  0x5b   :  { %v157_v23 = vld [vmem:[#allocation2 + $0x120] sm:$0xff]  ;;  %2472 = vmatpush1.bf16.msra.mxu0 %v4191_v26 }
  0x5c   :  { %v281_v24 = vld [vmem:[#allocation2 + $0x500] sm:$0xff]  ;;  %v4184_v28 = vcombine.high %v153_v22, %v157_v23  ;;  %2514 = vmatprep.subr.bf16.mxu1 %v4320_v21  ;;  %v4183_v34 = vcombine.low %v153_v22, %v157_v23 }
  0x5d   :  { %v285_v25 = vld [vmem:[#allocation2 + $0x520] sm:$0xff]  ;;  %2515 = vmatpush1.bf16.msra.mxu1 %v4319_v27 }
  0x5e   :  { %v4312_v29 = vcombine.high %v281_v24, %v285_v25  ;;  %v145_v30 = vld [vmem:[#allocation2 + $0xc0] sm:$0xff]  ;;  %2473 = vmatprep.subr.bf16.mxu0 %v4184_v28  ;;  %v4311_v35 = vcombine.low %v281_v24, %v285_v25 }
  0x5f   :  { %v149_v31 = vld [vmem:[#allocation2 + $0xe0] sm:$0xff]  ;;  %2474 = vmatpush1.bf16.msra.mxu0 %v4183_v34 }
  0x60   :  { %v273_v32 = vld [vmem:[#allocation2 + $0x4c0] sm:$0xff]  ;;  %v4176_v36 = vcombine.high %v145_v30, %v149_v31  ;;  %2516 = vmatprep.subr.bf16.mxu1 %v4312_v29  ;;  %v4175_v42 = vcombine.low %v145_v30, %v149_v31 }
  0x61   :  { %v277_v33 = vld [vmem:[#allocation2 + $0x4e0] sm:$0xff]  ;;  %2517 = vmatpush1.bf16.msra.mxu1 %v4311_v35 }
  0x62   :  { %v4304_v37 = vcombine.high %v273_v32, %v277_v33  ;;  %v137_v38 = vld [vmem:[#allocation2 + $0x80] sm:$0xff]  ;;  %2475 = vmatprep.subr.bf16.mxu0 %v4176_v36  ;;  %v4303_v43 = vcombine.low %v273_v32, %v277_v33 }
  0x63   :  { %v141_v39 = vld [vmem:[#allocation2 + $0xa0] sm:$0xff]  ;;  %2476 = vmatpush1.bf16.msra.mxu0 %v4175_v42 }
  0x64   :  { %v265_v40 = vld [vmem:[#allocation2 + $0x480] sm:$0xff]  ;;  %v4168_v44 = vcombine.high %v137_v38, %v141_v39  ;;  %2518 = vmatprep.subr.bf16.mxu1 %v4304_v37  ;;  %v4167_v50 = vcombine.low %v137_v38, %v141_v39 }
  0x65   :  { %v269_v41 = vld [vmem:[#allocation2 + $0x4a0] sm:$0xff]  ;;  %2519 = vmatpush1.bf16.msra.mxu1 %v4303_v43 }
  0x66   :  { %v4296_v45 = vcombine.high %v265_v40, %v269_v41  ;;  %v129_v46 = vld [vmem:[#allocation2 + $0x40] sm:$0xff]  ;;  %2477 = vmatprep.subr.bf16.mxu0 %v4168_v44  ;;  %v4295_v51 = vcombine.low %v265_v40, %v269_v41 }
  0x67   :  { %v133_v47 = vld [vmem:[#allocation2 + $0x60] sm:$0xff]  ;;  %2478 = vmatpush1.bf16.msra.mxu0 %v4167_v50 }
  0x68   :  { %v257_v48 = vld [vmem:[#allocation2 + $0x440] sm:$0xff]  ;;  %v4160_v52 = vcombine.high %v129_v46, %v133_v47  ;;  %2520 = vmatprep.subr.bf16.mxu1 %v4296_v45  ;;  %v4159_v0 = vcombine.low %v129_v46, %v133_v47 }
  0x69   :  { %v261_v49 = vld [vmem:[#allocation2 + $0x460] sm:$0xff]  ;;  %2521 = vmatpush1.bf16.msra.mxu1 %v4295_v51 }
  0x6a   :  { %v121_v53 = vld [vmem:[#allocation2] sm:$0xff]  ;;  %v4288_v56 = vcombine.high %v257_v48, %v261_v49  ;;  %2479 = vmatprep.subr.bf16.mxu0 %v4160_v52  ;;  %v4287_v1 = vcombine.low %v257_v48, %v261_v49 }
  0x6b   :  { %v125_v57 = vld [vmem:[#allocation2 + $0x20] sm:$0xff]  ;;  %2480 = vmatpush1.bf16.msra.mxu0 %v4159_v0 }
  0x6c   :  { %v249_v61 = vld [vmem:[#allocation2 + $0x400] sm:$0xff]  ;;  %v4152_v2 = vcombine.high %v121_v53, %v125_v57  ;;  %2522 = vmatprep.subr.bf16.mxu1 %v4288_v56  ;;  %v4151_v8 = vcombine.low %v121_v53, %v125_v57 }
  0x6d   :  { %v253_v62 = vld [vmem:[#allocation2 + $0x420] sm:$0xff]  ;;  %2523 = vmatpush1.bf16.msra.mxu1 %v4287_v1 }
  0x6e   :  { %v4280_v3 = vcombine.high %v249_v61, %v253_v62  ;;  %v241_v4 = vld [vmem:[#allocation2 + $0x3c0] sm:$0xff]  ;;  %2481 = vmatprep.subr.bf16.mxu0 %v4152_v2  ;;  %v4279_v9 = vcombine.low %v249_v61, %v253_v62 }
  0x6f   :  { %v245_v5 = vld [vmem:[#allocation2 + $0x3e0] sm:$0xff]  ;;  %2482 = vmatpush1.bf16.msra.mxu0 %v4151_v8  ;;  %v178_v8 = vld [vmem:[#allocation2 + $0x1c8] sm:$0xff] }
  0x70   :  { %v369_v6 = vld [vmem:[#allocation2 + $0x7c0] sm:$0xff]  ;;  %v4272_v10 = vcombine.high %v241_v4, %v245_v5  ;;  %2524 = vmatprep.subr.bf16.mxu1 %v4280_v3  ;;  %v4271_v16 = vcombine.low %v241_v4, %v245_v5 }
  0x71   :  { %v373_v7 = vld [vmem:[#allocation2 + $0x7e0] sm:$0xff]  ;;  %2525 = vmatpush1.bf16.msra.mxu1 %v4279_v9  ;;  %v182_v9 = vld [vmem:[#allocation2 + $0x1e8] sm:$0xff] }
  0x72   :  { %v4400_v11 = vcombine.high %v369_v6, %v373_v7  ;;  %v233_v12 = vld [vmem:[#allocation2 + $0x380] sm:$0xff]  ;;  %2483 = vmatprep.subr.bf16.mxu0 %v4272_v10  ;;  %v4399_v17 = vcombine.low %v369_v6, %v373_v7 }
  0x73   :  { %v237_v13 = vld [vmem:[#allocation2 + $0x3a0] sm:$0xff]  ;;  %2484 = vmatpush2.bf16.msra.mxu0 %v4271_v16 }
  0x74   :  { %v361_v14 = vld [vmem:[#allocation2 + $0x780] sm:$0xff]  ;;  %v4264_v18 = vcombine.high %v233_v12, %v237_v13  ;;  %2526 = vmatprep.subr.bf16.mxu1 %v4400_v11  ;;  %v4263_v24 = vcombine.low %v233_v12, %v237_v13  ;;  %v109_v12 = vld [vmem:[%s5268_s0 + $0x30] sm:$0xff] }
  0x75   :  { %v365_v15 = vld [vmem:[#allocation2 + $0x7a0] sm:$0xff]  ;;  %2527 = vmatpush2.bf16.msra.mxu1 %v4399_v17  ;;  %v4210_v17 = vcombine.high %v178_v8, %v182_v9 }
  0x76   :  { %v4392_v19 = vcombine.high %v361_v14, %v365_v15  ;;  %v225_v20 = vld [vmem:[#allocation2 + $0x340] sm:$0xff]  ;;  %2485 = vmatprep.subr.bf16.mxu0 %v4264_v18  ;;  %v4391_v25 = vcombine.low %v361_v14, %v365_v15  ;;  %v105_v14 = vld [vmem:[%s5268_s0 + $0x10] sm:$0xff] }
  0x77   :  { %v229_v21 = vld [vmem:[#allocation2 + $0x360] sm:$0xff]  ;;  %2486 = vmatpush2.bf16.msra.mxu0 %v4263_v24  ;;  %v114_v24 = vld [vmem:[%s5268_s0 + $0x58] sm:$0xff] }
  0x78   :  { %v353_v22 = vld [vmem:[#allocation2 + $0x740] sm:$0xff]  ;;  %v4256_v26 = vcombine.high %v225_v20, %v229_v21  ;;  %2528 = vmatprep.subr.bf16.mxu1 %v4392_v19  ;;  %v4255_v32 = vcombine.low %v225_v20, %v229_v21  ;;  %v170_v20 = vld [vmem:[#allocation2 + $0x188] sm:$0xff] }
  0x79   :  { %v357_v23 = vld [vmem:[#allocation2 + $0x760] sm:$0xff]  ;;  %2529 = vmatpush2.bf16.msra.mxu1 %v4391_v25 }
  0x7a   :  { %v4384_v27 = vcombine.high %v353_v22, %v357_v23  ;;  %v217_v28 = vld [vmem:[#allocation2 + $0x300] sm:$0xff]  ;;  %2487 = vmatprep.subr.bf16.mxu0 %v4256_v26  ;;  %v4383_v33 = vcombine.low %v353_v22, %v357_v23  ;;  %v174_v22 = vld [vmem:[#allocation2 + $0x1a8] sm:$0xff] }
  0x7b   :  { %v221_v29 = vld [vmem:[#allocation2 + $0x320] sm:$0xff]  ;;  %2488 = vmatpush2.bf16.msra.mxu0 %v4255_v32  ;;  %v108_v23 = vld [vmem:[%s5268_s0 + $0x28] sm:$0xff] }
  0x7c   :  { %v345_v30 = vld [vmem:[#allocation2 + $0x700] sm:$0xff]  ;;  %v4248_v34 = vcombine.high %v217_v28, %v221_v29  ;;  %2530 = vmatprep.subr.bf16.mxu1 %v4384_v27  ;;  %v4247_v40 = vcombine.low %v217_v28, %v221_v29  ;;  %v4209_v27 = vcombine.low %v178_v8, %v182_v9  ;;  %v4202_v29 = vcombine.high %v170_v20, %v174_v22 }
  0x7d   :  { %v349_v31 = vld [vmem:[#allocation2 + $0x720] sm:$0xff]  ;;  %2531 = vmatpush2.bf16.msra.mxu1 %v4383_v33  ;;  %v5161_v32 = vpack.c.bf16 %v114_v24, %v108_v23  ;;  %v162_v33 = vld [vmem:[#allocation2 + $0x148] sm:$0xff] }
  0x7e   :  { %v4376_v35 = vcombine.high %v345_v30, %v349_v31  ;;  %v209_v36 = vld [vmem:[#allocation2 + $0x2c0] sm:$0xff]  ;;  %2489 = vmatprep.subr.bf16.mxu0 %v4248_v34  ;;  %v4375_v41 = vcombine.low %v345_v30, %v349_v31  ;;  %v166_v34 = vld [vmem:[#allocation2 + $0x168] sm:$0xff] }
  0x7f   :  { %v213_v37 = vld [vmem:[#allocation2 + $0x2e0] sm:$0xff]  ;;  %2490 = vmatpush2.bf16.msra.mxu0 %v4247_v40  ;;  %v4194_v40 = vcombine.high %v162_v33, %v166_v34 }
  0x80   :  { %v337_v38 = vld [vmem:[#allocation2 + $0x6c0] sm:$0xff]  ;;  %v4240_v42 = vcombine.high %v209_v36, %v213_v37  ;;  %2532 = vmatprep.subr.bf16.mxu1 %v4376_v35  ;;  %v4239_v48 = vcombine.low %v209_v36, %v213_v37  ;;  %v4201_v36 = vcombine.low %v170_v20, %v174_v22  ;;  %v246_v20 = vld [vmem:[#allocation2 + $0x3e8] sm:$0xff] }
  0x81   :  { %v341_v39 = vld [vmem:[#allocation2 + $0x6e0] sm:$0xff]  ;;  %2533 = vmatpush2.bf16.msra.mxu1 %v4375_v41  ;;  %v154_v41 = vld [vmem:[#allocation2 + $0x108] sm:$0xff] }
  0x82   :  { %v4368_v43 = vcombine.high %v337_v38, %v341_v39  ;;  %v201_v44 = vld [vmem:[#allocation2 + $0x280] sm:$0xff]  ;;  %2491 = vmatprep.subr.bf16.mxu0 %v4240_v42  ;;  %v4367_v49 = vcombine.low %v337_v38, %v341_v39  ;;  %v158_v42 = vld [vmem:[#allocation2 + $0x128] sm:$0xff] }
  0x83   :  { %v205_v45 = vld [vmem:[#allocation2 + $0x2a0] sm:$0xff]  ;;  %2492 = vmatpush2.bf16.msra.mxu0 %v4239_v48  ;;  %v146_v48 = vld [vmem:[#allocation2 + $0xc8] sm:$0xff] }
  0x84   :  { %v329_v46 = vld [vmem:[#allocation2 + $0x680] sm:$0xff]  ;;  %v4232_v50 = vcombine.high %v201_v44, %v205_v45  ;;  %2534 = vmatprep.subr.bf16.mxu1 %v4368_v43  ;;  %v4231_v56 = vcombine.low %v201_v44, %v205_v45  ;;  %v4193_v44 = vcombine.low %v162_v33, %v166_v34 }
  0x85   :  { %v333_v47 = vld [vmem:[#allocation2 + $0x6a0] sm:$0xff]  ;;  %2535 = vmatpush2.bf16.msra.mxu1 %v4367_v49  ;;  %v4186_v49 = vcombine.high %v154_v41, %v158_v42 }
  0x86   :  { %v4360_v51 = vcombine.high %v329_v46, %v333_v47  ;;  %v193_v52 = vld [vmem:[#allocation2 + $0x240] sm:$0xff]  ;;  %2493 = vmatprep.subr.bf16.mxu0 %v4232_v50  ;;  %v4359_v57 = vcombine.low %v329_v46, %v333_v47  ;;  %v150_v50 = vld [vmem:[#allocation2 + $0xe8] sm:$0xff] }
  0x87   :  { %v197_v53 = vld [vmem:[#allocation2 + $0x260] sm:$0xff]  ;;  %2494 = vmatpush2.bf16.msra.mxu0 %v4231_v56  ;;  %v138_v56 = vld [vmem:[#allocation2 + $0x88] sm:$0xff] }
  0x88   :  { %v321_v54 = vld [vmem:[#allocation2 + $0x640] sm:$0xff]  ;;  %v4224_v59 = vcombine.high %v193_v52, %v197_v53  ;;  %2536 = vmatprep.subr.bf16.mxu1 %v4360_v51  ;;  %v4223_v2 = vcombine.low %v193_v52, %v197_v53  ;;  %v4185_v52 = vcombine.low %v154_v41, %v158_v42 }
  0x89   :  { %v325_v55 = vld [vmem:[#allocation2 + $0x660] sm:$0xff]  ;;  %2537 = vmatpush2.bf16.msra.mxu1 %v4359_v57  ;;  %v4178_v57 = vcombine.high %v146_v48, %v150_v50 }
  0x8a   :  { %v4352_v60 = vcombine.high %v321_v54, %v325_v55  ;;  %v185_v61 = vld [vmem:[#allocation2 + $0x200] sm:$0xff]  ;;  %2495 = vmatprep.subr.bf16.mxu0 %v4224_v59  ;;  %v4351_v3 = vcombine.low %v321_v54, %v325_v55  ;;  %v142_v59 = vld [vmem:[#allocation2 + $0xa8] sm:$0xff] }
  0x8b   :  { %v189_v62 = vld [vmem:[#allocation2 + $0x220] sm:$0xff]  ;;  %2496 = vmatpush2.bf16.msra.mxu0 %v4223_v2  ;;  %v130_v2 = vld [vmem:[#allocation2 + $0x48] sm:$0xff] }
  0x8c   :  { %v313_v0 = vld [vmem:[#allocation2 + $0x600] sm:$0xff]  ;;  %v4216_v4 = vcombine.high %v185_v61, %v189_v62  ;;  %2538 = vmatprep.subr.bf16.mxu1 %v4352_v60  ;;  %v4215_v10 = vcombine.low %v185_v61, %v189_v62  ;;  %v4177_v61 = vcombine.low %v146_v48, %v150_v50 }
  0x8d   :  { %v317_v1 = vld [vmem:[#allocation2 + $0x620] sm:$0xff]  ;;  %2539 = vmatpush2.bf16.msra.mxu1 %v4351_v3  ;;  %v4170_v3 = vcombine.high %v138_v56, %v142_v59 }
  0x8e   :  { %v4344_v5 = vcombine.high %v313_v0, %v317_v1  ;;  %v433_v6 = vld [vmem:[#allocation2 + $0x9c0] sm:$0xff]  ;;  %2497 = vmatprep.subr.bf16.mxu0 %v4216_v4  ;;  %v4343_v13 = vcombine.low %v313_v0, %v317_v1  ;;  %v134_v4 = vld [vmem:[#allocation2 + $0x68] sm:$0xff] }
  0x8f   :  { %v437_v7 = vld [vmem:[#allocation2 + $0x9e0] sm:$0xff]  ;;  %2498 = vmatpush2.bf16.msra.mxu0 %v4215_v10  ;;  %v122_v10 = vld [vmem:[#allocation2 + $0x8] sm:$0xff] }
  0x90   :  { %v103_v11 = vld [vmem:[%s5268_s0] sm:$0xff]  ;;  %v4464_v16 = vcombine.high %v433_v6, %v437_v7  ;;  %2540 = vmatprep.subr.bf16.mxu1 %v4344_v5  ;;  %v4463_v26 = vcombine.low %v433_v6, %v437_v7  ;;  %v4169_v6 = vcombine.low %v138_v56, %v142_v59 }
  0x91   :  { %v111_v15 = vld [vmem:[%s5268_s0 + $0x40] sm:$0xff]  ;;  %v5151_v21 = vpack.c.bf16 %v109_v12, %v103_v11  ;;  %2541 = vmatpush2.bf16.msra.mxu1 %v4343_v13  ;;  %v4162_v11 = vcombine.high %v130_v2, %v134_v4  ;;  %v126_v12 = vld [vmem:[#allocation2 + $0x28] sm:$0xff] }
  0x92   :  { %v425_v18 = vld [vmem:[#allocation2 + $0x980] sm:$0xff]  ;;  %v5159_v25 = vpack.c.bf16 %v111_v15, %v105_v14  ;;  %2553 = vmatprep.subr.bf16.mxu0 %v4464_v16  ;;  %2596 = vmatprep.subr.bf16.mxu1 %v4210_v17  ;;  %v4161_v14 = vcombine.low %v130_v2, %v134_v4  ;;  %v4153_v23 = vcombine.low %v122_v10, %v126_v12 }
  0x93   :  { %v429_v19 = vld [vmem:[#allocation2 + $0x9a0] sm:$0xff]  ;;  %2500 = vmatmul.mubr.bf16.vlgmr.msra.gmra.mxu0 %v5151_v21 }
  0x94   :  { %v4456_v28 = vcombine.high %v425_v18, %v429_v19  ;;  %v417_v30 = vld [vmem:[#allocation2 + $0x940] sm:$0xff]  ;;  %2543 = vmatmul.mubr.bf16.vlgmr.msra.gmra.mxu1 %v5159_v25  ;;  %2554 = vmatpush1.bf16.msra.mxu0 %v4463_v26  ;;  %v4455_v35 = vcombine.low %v425_v18, %v429_v19  ;;  %v242_v18 = vld [vmem:[#allocation2 + $0x3c8] sm:$0xff]  ;;  %v4154_v19 = vcombine.high %v122_v10, %v126_v12 }
  0x95   :  { %v421_v31 = vld [vmem:[#allocation2 + $0x960] sm:$0xff]  ;;  %2597 = vmatpush1.bf16.msra.mxu1 %v4209_v27  ;;  %2585 = vmatprep.mubr.bf16.mxu0 %v5161_v32  ;;  %v4273_v33 = vcombine.low %v242_v18, %v246_v20 }
  0x96   :  { %2555 = vmatprep.subr.bf16.mxu0 %v4456_v28  ;;  %v4448_v37 = vcombine.high %v417_v30, %v421_v31  ;;  %v409_v38 = vld [vmem:[#allocation2 + $0x900] sm:$0xff]  ;;  %2598 = vmatprep.subr.bf16.mxu1 %v4202_v29  ;;  %v4447_v43 = vcombine.low %v417_v30, %v421_v31  ;;  %v234_v28 = vld [vmem:[#allocation2 + $0x388] sm:$0xff]  ;;  %v4274_v29 = vcombine.high %v242_v18, %v246_v20 }
  0x97   :  { %v413_v39 = vld [vmem:[#allocation2 + $0x920] sm:$0xff]  ;;  %2628 = vmatprep.mubr.bf16.mxu1 %v5127_v58  ;;  %v238_v30 = vld [vmem:[#allocation2 + $0x3a8] sm:$0xff] }
  0x98   :  { %2556 = vmatpush1.bf16.msra.mxu0 %v4455_v35  ;;  %v4440_v45 = vcombine.high %v409_v38, %v413_v39  ;;  %v401_v46 = vld [vmem:[#allocation2 + $0x8c0] sm:$0xff]  ;;  %v4439_v51 = vcombine.low %v409_v38, %v413_v39  ;;  %v4266_v38 = vcombine.high %v234_v28, %v238_v30  ;;  %v230_v39 = vld [vmem:[#allocation2 + $0x368] sm:$0xff]  ;;  %v4265_v41 = vcombine.low %v234_v28, %v238_v30  ;;  %v113_v28 = vld [vmem:[%s5268_s0 + $0x50] sm:$0xff] }
  0x99   :  { %2599 = vmatpush1.bf16.msra.mxu1 %v4201_v36  ;;  %2557 = vmatprep.subr.bf16.mxu0 %v4448_v37  ;;  %v405_v47 = vld [vmem:[#allocation2 + $0x8e0] sm:$0xff]  ;;  %v226_v37 = vld [vmem:[#allocation2 + $0x348] sm:$0xff] }
  0x9a   :  { %2600 = vmatprep.subr.bf16.mxu1 %v4194_v40  ;;  %v4432_v53 = vcombine.high %v401_v46, %v405_v47  ;;  %v393_v54 = vld [vmem:[#allocation2 + $0x880] sm:$0xff]  ;;  %v4431_v60 = vcombine.low %v401_v46, %v405_v47  ;;  %v4258_v46 = vcombine.high %v226_v37, %v230_v39  ;;  %v222_v47 = vld [vmem:[#allocation2 + $0x328] sm:$0xff] }
  0x9b   :  { %v397_v55 = vld [vmem:[#allocation2 + $0x8a0] sm:$0xff] }
  0x9c   :  { %2558 = vmatpush1.bf16.msra.mxu0 %v4447_v43  ;;  %v4424_v62 = vcombine.high %v393_v54, %v397_v55  ;;  %v385_v0 = vld [vmem:[#allocation2 + $0x840] sm:$0xff]  ;;  %v4423_v5 = vcombine.low %v393_v54, %v397_v55  ;;  %v214_v55 = vld [vmem:[#allocation2 + $0x2e8] sm:$0xff] }
  0x9d   :  { %2601 = vmatpush1.bf16.msra.mxu1 %v4193_v44  ;;  %2559 = vmatprep.subr.bf16.mxu0 %v4440_v45  ;;  %v389_v1 = vld [vmem:[#allocation2 + $0x860] sm:$0xff]  ;;  %v218_v45 = vld [vmem:[#allocation2 + $0x308] sm:$0xff] }
  0x9e   :  { %2602 = vmatprep.subr.bf16.mxu1 %v4186_v49  ;;  %v4416_v7 = vcombine.high %v385_v0, %v389_v1  ;;  %v377_v8 = vld [vmem:[#allocation2 + $0x800] sm:$0xff]  ;;  %v4415_v13 = vcombine.low %v385_v0, %v389_v1  ;;  %v4257_v49 = vcombine.low %v226_v37, %v230_v39  ;;  %v4250_v54 = vcombine.high %v218_v45, %v222_v47  ;;  %v206_v1 = vld [vmem:[#allocation2 + $0x2a8] sm:$0xff] }
  0x9f   :  { %v381_v9 = vld [vmem:[#allocation2 + $0x820] sm:$0xff] }
  0xa0   :  { %2560 = vmatpush1.bf16.msra.mxu0 %v4439_v51  ;;  %v4408_v15 = vcombine.high %v377_v8, %v381_v9  ;;  %v497_v16 = vld [vmem:[#allocation2 + $0xbc0] sm:$0xff]  ;;  %v4407_v22 = vcombine.low %v377_v8, %v381_v9  ;;  %v198_v9 = vld [vmem:[#allocation2 + $0x268] sm:$0xff] }
  0xa1   :  { %2603 = vmatpush1.bf16.msra.mxu1 %v4185_v52  ;;  %2561 = vmatprep.subr.bf16.mxu0 %v4432_v53  ;;  %v501_v17 = vld [vmem:[#allocation2 + $0xbe0] sm:$0xff]  ;;  %v210_v53 = vld [vmem:[#allocation2 + $0x2c8] sm:$0xff] }
  0xa2   :  { %2604 = vmatprep.subr.bf16.mxu1 %v4178_v57  ;;  %v4528_v24 = vcombine.high %v497_v16, %v501_v17  ;;  %v489_v26 = vld [vmem:[#allocation2 + $0xb80] sm:$0xff]  ;;  %v4527_v31 = vcombine.low %v497_v16, %v501_v17  ;;  %v4249_v57 = vcombine.low %v218_v45, %v222_v47  ;;  %v4242_v0 = vcombine.high %v210_v53, %v214_v55  ;;  %v190_v17 = vld [vmem:[#allocation2 + $0x228] sm:$0xff] }
  0xa3   :  { %v493_v27 = vld [vmem:[#allocation2 + $0xba0] sm:$0xff]  ;;  %v422_v47 = vld [vmem:[#allocation2 + $0x968] sm:$0xff] }
  0xa4   :  { %2562 = vmatpush1.bf16.msra.mxu0 %v4431_v60  ;;  %v4520_v34 = vcombine.high %v489_v26, %v493_v27  ;;  %v481_v35 = vld [vmem:[#allocation2 + $0xb40] sm:$0xff]  ;;  %v4519_v40 = vcombine.low %v489_v26, %v493_v27 }
  0xa5   :  { %2605 = vmatpush1.bf16.msra.mxu1 %v4177_v61  ;;  %2563 = vmatprep.subr.bf16.mxu0 %v4424_v62  ;;  %v485_v36 = vld [vmem:[#allocation2 + $0xb60] sm:$0xff]  ;;  %v202_v62 = vld [vmem:[#allocation2 + $0x288] sm:$0xff] }
  0xa6   :  { %2606 = vmatprep.subr.bf16.mxu1 %v4170_v3  ;;  %v4512_v42 = vcombine.high %v481_v35, %v485_v36  ;;  %v473_v43 = vld [vmem:[#allocation2 + $0xb00] sm:$0xff]  ;;  %v4511_v48 = vcombine.low %v481_v35, %v485_v36  ;;  %v4241_v3 = vcombine.low %v210_v53, %v214_v55  ;;  %v4234_v8 = vcombine.high %v202_v62, %v206_v1  ;;  %v302_v35 = vld [vmem:[#allocation2 + $0x5a8] sm:$0xff] }
  0xa7   :  { %v477_v44 = vld [vmem:[#allocation2 + $0xb20] sm:$0xff]  ;;  %v426_v36 = vld [vmem:[#allocation2 + $0x988] sm:$0xff] }
  0xa8   :  { %2564 = vmatpush1.bf16.msra.mxu0 %v4423_v5  ;;  %v4504_v50 = vcombine.high %v473_v43, %v477_v44  ;;  %v465_v51 = vld [vmem:[#allocation2 + $0xac0] sm:$0xff]  ;;  %v4503_v56 = vcombine.low %v473_v43, %v477_v44  ;;  %v290_v43 = vld [vmem:[#allocation2 + $0x548] sm:$0xff] }
  0xa9   :  { %2607 = vmatpush1.bf16.msra.mxu1 %v4169_v6  ;;  %2565 = vmatprep.subr.bf16.mxu0 %v4416_v7  ;;  %v469_v52 = vld [vmem:[#allocation2 + $0xae0] sm:$0xff]  ;;  %v194_v7 = vld [vmem:[#allocation2 + $0x248] sm:$0xff] }
  0xaa   :  { %2608 = vmatprep.subr.bf16.mxu1 %v4162_v11  ;;  %v4496_v59 = vcombine.high %v465_v51, %v469_v52  ;;  %v457_v60 = vld [vmem:[#allocation2 + $0xa80] sm:$0xff]  ;;  %v4495_v2 = vcombine.low %v465_v51, %v469_v52  ;;  %v4233_v11 = vcombine.low %v202_v62, %v206_v1  ;;  %v4226_v16 = vcombine.high %v194_v7, %v198_v9  ;;  %v294_v44 = vld [vmem:[#allocation2 + $0x568] sm:$0xff] }
  0xab   :  { %v461_v61 = vld [vmem:[#allocation2 + $0xaa0] sm:$0xff]  ;;  %v282_v51 = vld [vmem:[#allocation2 + $0x508] sm:$0xff] }
  0xac   :  { %2566 = vmatpush1.bf16.msra.mxu0 %v4415_v13  ;;  %v4488_v4 = vcombine.high %v457_v60, %v461_v61  ;;  %v449_v5 = vld [vmem:[#allocation2 + $0xa40] sm:$0xff]  ;;  %v4487_v10 = vcombine.low %v457_v60, %v461_v61  ;;  %v286_v52 = vld [vmem:[#allocation2 + $0x528] sm:$0xff] }
  0xad   :  { %2609 = vmatpush1.bf16.msra.mxu1 %v4161_v14  ;;  %2567 = vmatprep.subr.bf16.mxu0 %v4408_v15  ;;  %v453_v6 = vld [vmem:[#allocation2 + $0xa60] sm:$0xff]  ;;  %v186_v15 = vld [vmem:[#allocation2 + $0x208] sm:$0xff] }
  0xae   :  { %2610 = vmatprep.subr.bf16.mxu1 %v4154_v19  ;;  %v4480_v12 = vcombine.high %v449_v5, %v453_v6  ;;  %v441_v13 = vld [vmem:[#allocation2 + $0xa00] sm:$0xff]  ;;  %v4479_v18 = vcombine.low %v449_v5, %v453_v6  ;;  %v4225_v19 = vcombine.low %v194_v7, %v198_v9  ;;  %v4218_v26 = vcombine.high %v186_v15, %v190_v17  ;;  %v410_v53 = vld [vmem:[#allocation2 + $0x908] sm:$0xff] }
  0xaf   :  { %v445_v14 = vld [vmem:[#allocation2 + $0xa20] sm:$0xff]  ;;  %v414_v55 = vld [vmem:[#allocation2 + $0x928] sm:$0xff] }
  0xb0   :  { %2568 = vmatpush1.bf16.msra.mxu0 %v4407_v22  ;;  %v4472_v20 = vcombine.high %v441_v13, %v445_v14  ;;  %v306_v22 = vld [vmem:[#allocation2 + $0x5c8] sm:$0xff]  ;;  %v107_v27 = vld [vmem:[%s5268_s0 + $0x20] sm:$0xff]  ;;  %v4471_v30 = vcombine.low %v441_v13, %v445_v14 }
  0xb1   :  { %2611 = vmatpush1.bf16.msra.mxu1 %v4153_v23  ;;  %2569 = vmatprep.subr.bf16.mxu0 %v4528_v24  ;;  %v310_v23 = vld [vmem:[#allocation2 + $0x5e8] sm:$0xff]  ;;  %v5173_v39 = vpack.c.bf16 %v113_v28, %v107_v27 }
  0xb2   :  { %2612 = vmatprep.subr.bf16.mxu1 %v4274_v29  ;;  %v434_v24 = vld [vmem:[#allocation2 + $0x9c8] sm:$0xff] }
  0xb3   :  { %v438_v29 = vld [vmem:[#allocation2 + $0x9e8] sm:$0xff] }
  0xb4   :  { %2570 = vmatpush2.bf16.msra.mxu0 %v4527_v31  ;;  %v4217_v31 = vcombine.low %v186_v15, %v190_v17  ;;  %v4466_v37 = vcombine.high %v434_v24, %v438_v29  ;;  %v274_v60 = vld [vmem:[#allocation2 + $0x4c8] sm:$0xff] }
  0xb5   :  { %2613 = vmatpush2.bf16.msra.mxu1 %v4273_v33  ;;  %2571 = vmatprep.subr.bf16.mxu0 %v4520_v34  ;;  %v4338_v33 = vcombine.high %v306_v22, %v310_v23  ;;  %v298_v34 = vld [vmem:[#allocation2 + $0x588] sm:$0xff] }
  0xb6   :  { %2614 = vmatprep.subr.bf16.mxu1 %v4266_v38  ;;  %v430_v38 = vld [vmem:[#allocation2 + $0x9a8] sm:$0xff] }
  0xb7   :  { %v4458_v45 = vcombine.high %v426_v36, %v430_v38  ;;  %v278_v61 = vld [vmem:[#allocation2 + $0x4e8] sm:$0xff] }
  0xb8   :  { %2572 = vmatpush2.bf16.msra.mxu0 %v4519_v40  ;;  %v4337_v40 = vcombine.low %v306_v22, %v310_v23  ;;  %v402_v62 = vld [vmem:[#allocation2 + $0x8c8] sm:$0xff] }
  0xb9   :  { %2615 = vmatpush2.bf16.msra.mxu1 %v4265_v41  ;;  %2573 = vmatprep.subr.bf16.mxu0 %v4512_v42  ;;  %v4465_v41 = vcombine.low %v434_v24, %v438_v29  ;;  %v4330_v42 = vcombine.high %v298_v34, %v302_v35  ;;  %v406_v1 = vld [vmem:[#allocation2 + $0x8e8] sm:$0xff] }
  0xba   :  { %2616 = vmatprep.subr.bf16.mxu1 %v4258_v46  ;;  %v418_v46 = vld [vmem:[#allocation2 + $0x948] sm:$0xff] }
  0xbb   :  { %v266_v5 = vld [vmem:[#allocation2 + $0x488] sm:$0xff] }
  0xbc   :  { %2574 = vmatpush2.bf16.msra.mxu0 %v4511_v48  ;;  %v4329_v48 = vcombine.low %v298_v34, %v302_v35  ;;  %v270_v6 = vld [vmem:[#allocation2 + $0x4a8] sm:$0xff] }
  0xbd   :  { %2617 = vmatpush2.bf16.msra.mxu1 %v4257_v49  ;;  %2575 = vmatprep.subr.bf16.mxu0 %v4504_v50  ;;  %v4457_v49 = vcombine.low %v426_v36, %v430_v38  ;;  %v4322_v50 = vcombine.high %v290_v43, %v294_v44  ;;  %v394_v7 = vld [vmem:[#allocation2 + $0x888] sm:$0xff] }
  0xbe   :  { %2618 = vmatprep.subr.bf16.mxu1 %v4250_v54  ;;  %v4450_v54 = vcombine.high %v418_v46, %v422_v47  ;;  %v398_v9 = vld [vmem:[#allocation2 + $0x8a8] sm:$0xff] }
  0xbf   :  { %v258_v13 = vld [vmem:[#allocation2 + $0x448] sm:$0xff] }
  0xc0   :  { %2576 = vmatpush2.bf16.msra.mxu0 %v4503_v56  ;;  %v4321_v56 = vcombine.low %v290_v43, %v294_v44  ;;  %v262_v14 = vld [vmem:[#allocation2 + $0x468] sm:$0xff] }
  0xc1   :  { %2619 = vmatpush2.bf16.msra.mxu1 %v4249_v57  ;;  %2577 = vmatprep.subr.bf16.mxu0 %v4496_v59  ;;  %v4449_v57 = vcombine.low %v418_v46, %v422_v47  ;;  %v4314_v59 = vcombine.high %v282_v51, %v286_v52  ;;  %v386_v15 = vld [vmem:[#allocation2 + $0x848] sm:$0xff]  ;;  %v4289_v28 = vcombine.low %v258_v13, %v262_v14 }
  0xc2   :  { %2620 = vmatprep.subr.bf16.mxu1 %v4242_v0  ;;  %v4442_v0 = vcombine.high %v410_v53, %v414_v55  ;;  %v390_v17 = vld [vmem:[#allocation2 + $0x868] sm:$0xff] }
  0xc3   :  { %v250_v22 = vld [vmem:[#allocation2 + $0x408] sm:$0xff]  ;;  %v4418_v23 = vcombine.high %v386_v15, %v390_v17  ;;  %v4417_v29 = vcombine.low %v386_v15, %v390_v17 }
  0xc4   :  { %2578 = vmatpush2.bf16.msra.mxu0 %v4495_v2  ;;  %v4313_v2 = vcombine.low %v282_v51, %v286_v52  ;;  %v254_v24 = vld [vmem:[#allocation2 + $0x428] sm:$0xff] }
  0xc5   :  { %2621 = vmatpush2.bf16.msra.mxu1 %v4241_v3  ;;  %2579 = vmatprep.subr.bf16.mxu0 %v4488_v4  ;;  %v4441_v3 = vcombine.low %v410_v53, %v414_v55  ;;  %v4306_v4 = vcombine.high %v274_v60, %v278_v61  ;;  %v382_v27 = vld [vmem:[#allocation2 + $0x828] sm:$0xff] }
  0xc6   :  { %2622 = vmatprep.subr.bf16.mxu1 %v4234_v8  ;;  %v4434_v8 = vcombine.high %v402_v62, %v406_v1  ;;  %v374_v34 = vld [vmem:[#allocation2 + $0x7e8] sm:$0xff] }
  0xc7   :  { %v498_v35 = vld [vmem:[#allocation2 + $0xbc8] sm:$0xff] }
  0xc8   :  { %2580 = vmatpush2.bf16.msra.mxu0 %v4487_v10  ;;  %v4305_v10 = vcombine.low %v274_v60, %v278_v61  ;;  %v502_v36 = vld [vmem:[#allocation2 + $0xbe8] sm:$0xff] }
  0xc9   :  { %2623 = vmatpush2.bf16.msra.mxu1 %v4233_v11  ;;  %2581 = vmatprep.subr.bf16.mxu0 %v4480_v12  ;;  %v4433_v11 = vcombine.low %v402_v62, %v406_v1  ;;  %v4298_v12 = vcombine.high %v266_v5, %v270_v6  ;;  %v366_v43 = vld [vmem:[#allocation2 + $0x7a8] sm:$0xff]  ;;  %v4529_v47 = vcombine.low %v498_v35, %v502_v36 }
  0xca   :  { %2624 = vmatprep.subr.bf16.mxu1 %v4226_v16  ;;  %v4426_v16 = vcombine.high %v394_v7, %v398_v9  ;;  %v490_v44 = vld [vmem:[#allocation2 + $0xb88] sm:$0xff] }
  0xcb   :  { %v358_v51 = vld [vmem:[#allocation2 + $0x768] sm:$0xff] }
  0xcc   :  { %2582 = vmatpush2.bf16.msra.mxu0 %v4479_v18  ;;  %v4297_v18 = vcombine.low %v266_v5, %v270_v6  ;;  %v482_v52 = vld [vmem:[#allocation2 + $0xb48] sm:$0xff] }
  0xcd   :  { %2625 = vmatpush2.bf16.msra.mxu1 %v4225_v19  ;;  %2583 = vmatprep.subr.bf16.mxu0 %v4472_v20  ;;  %v4425_v19 = vcombine.low %v394_v7, %v398_v9  ;;  %v4290_v20 = vcombine.high %v258_v13, %v262_v14  ;;  %v486_v53 = vld [vmem:[#allocation2 + $0xb68] sm:$0xff] }
  0xce   :  { %2626 = vmatprep.subr.bf16.mxu1 %v4218_v26  ;;  %v378_v26 = vld [vmem:[#allocation2 + $0x808] sm:$0xff]  ;;  %v4513_v1 = vcombine.low %v482_v52, %v486_v53 }
  0xcf   :  { %v4409_v38 = vcombine.low %v378_v26, %v382_v27  ;;  %v350_v60 = vld [vmem:[#allocation2 + $0x728] sm:$0xff] }
  0xd0   :  { %2584 = vmatpush2.bf16.msra.mxu0 %v4471_v30  ;;  %v4282_v30 = vcombine.high %v250_v22, %v254_v24  ;;  %v474_v61 = vld [vmem:[#allocation2 + $0xb08] sm:$0xff] }
  0xd1   :  { %2627 = vmatpush2.bf16.msra.mxu1 %v4217_v31  ;;  %2639 = vmatprep.subr.bf16.mxu0 %v4338_v33  ;;  %v4410_v31 = vcombine.high %v378_v26, %v382_v27  ;;  %v370_v33 = vld [vmem:[#allocation2 + $0x7c8] sm:$0xff] }
  0xd2   :  { %2682 = vmatprep.subr.bf16.mxu1 %v4466_v37  ;;  %v4281_v37 = vcombine.low %v250_v22, %v254_v24  ;;  %v4401_v46 = vcombine.low %v370_v33, %v374_v34  ;;  %v478_v62 = vld [vmem:[#allocation2 + $0xb28] sm:$0xff] }
  0xd3   :  { %2586 = vmatmul.mubr.bf16.vlgmr.msra.gmra.mxu0 %v5173_v39  ;;  %v342_v5 = vld [vmem:[#allocation2 + $0x6e8] sm:$0xff]  ;;  %v4505_v9 = vcombine.low %v474_v61, %v478_v62 }
  0xd4   :  { %2629 = vmatmul.mubr.bf16.vlgmr.msra.gmra.mxu1 %v5151_v21  ;;  %2640 = vmatpush1.bf16.msra.mxu0 %v4337_v40  ;;  %v4402_v40 = vcombine.high %v370_v33, %v374_v34  ;;  %v466_v6 = vld [vmem:[#allocation2 + $0xac8] sm:$0xff] }
  0xd5   :  { %2683 = vmatpush1.bf16.msra.mxu1 %v4465_v41  ;;  %2641 = vmatprep.subr.bf16.mxu0 %v4330_v42  ;;  %v4530_v41 = vcombine.high %v498_v35, %v502_v36  ;;  %v362_v42 = vld [vmem:[#allocation2 + $0x788] sm:$0xff] }
  0xd6   :  { %2684 = vmatprep.subr.bf16.mxu1 %v4458_v45  ;;  %2671 = vmatprep.mubr.bf16.mxu0 %v5135_v63  ;;  %v494_v45 = vld [vmem:[#allocation2 + $0xba8] sm:$0xff] }
  0xd7   :  { %2714 = vmatprep.mubr.bf16.mxu1 %v5161_v32  ;;  %v4521_v55 = vcombine.low %v490_v44, %v494_v45  ;;  %v470_v7 = vld [vmem:[#allocation2 + $0xae8] sm:$0xff] }
  0xd8   :  { %2642 = vmatpush1.bf16.msra.mxu0 %v4329_v48  ;;  %v4394_v48 = vcombine.high %v362_v42, %v366_v43  ;;  %v334_v13 = vld [vmem:[#allocation2 + $0x6a8] sm:$0xff]  ;;  %v4497_v17 = vcombine.low %v466_v6, %v470_v7 }
  0xd9   :  { %2685 = vmatpush1.bf16.msra.mxu1 %v4457_v49  ;;  %2643 = vmatprep.subr.bf16.mxu0 %v4322_v50  ;;  %v4522_v49 = vcombine.high %v490_v44, %v494_v45  ;;  %v354_v50 = vld [vmem:[#allocation2 + $0x748] sm:$0xff] }
  0xda   :  { %2686 = vmatprep.subr.bf16.mxu1 %v4450_v54  ;;  %v4393_v54 = vcombine.low %v362_v42, %v366_v43  ;;  %v458_v14 = vld [vmem:[#allocation2 + $0xa88] sm:$0xff]  ;;  %v307_v42 = vld [vmem:[#allocation2 + $0x5d0] sm:$0xff] }
  0xdb   :  { %v462_v15 = vld [vmem:[#allocation2 + $0xaa8] sm:$0xff]  ;;  %v311_v43 = vld [vmem:[#allocation2 + $0x5f0] sm:$0xff] }
  0xdc   :  { %2644 = vmatpush1.bf16.msra.mxu0 %v4321_v56  ;;  %v4386_v56 = vcombine.high %v354_v50, %v358_v51  ;;  %v326_v22 = vld [vmem:[#allocation2 + $0x668] sm:$0xff]  ;;  %v4489_v27 = vcombine.low %v458_v14, %v462_v15 }
  0xdd   :  { %2687 = vmatpush1.bf16.msra.mxu1 %v4449_v57  ;;  %2645 = vmatprep.subr.bf16.mxu0 %v4314_v59  ;;  %v4514_v57 = vcombine.high %v482_v52, %v486_v53  ;;  %v346_v59 = vld [vmem:[#allocation2 + $0x708] sm:$0xff]  ;;  %v4339_v53 = vcombine.low %v307_v42, %v311_v43 }
  0xde   :  { %2688 = vmatprep.subr.bf16.mxu1 %v4442_v0  ;;  %v4385_v0 = vcombine.low %v354_v50, %v358_v51  ;;  %v454_v24 = vld [vmem:[#allocation2 + $0xa68] sm:$0xff]  ;;  %v299_v50 = vld [vmem:[#allocation2 + $0x590] sm:$0xff] }
  0xdf   :  { %v442_v33 = vld [vmem:[#allocation2 + $0xa08] sm:$0xff]  ;;  %v303_v51 = vld [vmem:[#allocation2 + $0x5b0] sm:$0xff] }
  0xe0   :  { %2646 = vmatpush1.bf16.msra.mxu0 %v4313_v2  ;;  %v4378_v2 = vcombine.high %v346_v59, %v350_v60  ;;  %v446_v34 = vld [vmem:[#allocation2 + $0xa28] sm:$0xff] }
  0xe1   :  { %2689 = vmatpush1.bf16.msra.mxu1 %v4441_v3  ;;  %2647 = vmatprep.subr.bf16.mxu0 %v4306_v4  ;;  %v4506_v3 = vcombine.high %v474_v61, %v478_v62  ;;  %v338_v4 = vld [vmem:[#allocation2 + $0x6c8] sm:$0xff]  ;;  %v4473_v45 = vcombine.low %v442_v33, %v446_v34  ;;  %v4331_v62 = vcombine.low %v299_v50, %v303_v51 }
  0xe2   :  { %2690 = vmatprep.subr.bf16.mxu1 %v4434_v8  ;;  %v4377_v8 = vcombine.low %v346_v59, %v350_v60  ;;  %v291_v59 = vld [vmem:[#allocation2 + $0x550] sm:$0xff] }
  0xe3   :  { %v295_v60 = vld [vmem:[#allocation2 + $0x570] sm:$0xff] }
  0xe4   :  { %2648 = vmatpush1.bf16.msra.mxu0 %v4305_v10  ;;  %v4370_v10 = vcombine.high %v338_v4, %v342_v5 }
  0xe5   :  { %2691 = vmatpush1.bf16.msra.mxu1 %v4433_v11  ;;  %2649 = vmatprep.subr.bf16.mxu0 %v4298_v12  ;;  %v4498_v11 = vcombine.high %v466_v6, %v470_v7  ;;  %v330_v12 = vld [vmem:[#allocation2 + $0x688] sm:$0xff]  ;;  %v4323_v7 = vcombine.low %v291_v59, %v295_v60 }
  0xe6   :  { %2692 = vmatprep.subr.bf16.mxu1 %v4426_v16  ;;  %v4369_v16 = vcombine.low %v338_v4, %v342_v5  ;;  %v4361_v26 = vcombine.low %v330_v12, %v334_v13  ;;  %v283_v4 = vld [vmem:[#allocation2 + $0x510] sm:$0xff] }
  0xe7   :  { %v287_v5 = vld [vmem:[#allocation2 + $0x530] sm:$0xff] }
  0xe8   :  { %2650 = vmatpush1.bf16.msra.mxu0 %v4297_v18  ;;  %v4362_v18 = vcombine.high %v330_v12, %v334_v13  ;;  %v275_v12 = vld [vmem:[#allocation2 + $0x4d0] sm:$0xff] }
  0xe9   :  { %2693 = vmatpush1.bf16.msra.mxu1 %v4425_v19  ;;  %2651 = vmatprep.subr.bf16.mxu0 %v4290_v20  ;;  %v4490_v19 = vcombine.high %v458_v14, %v462_v15  ;;  %v322_v20 = vld [vmem:[#allocation2 + $0x648] sm:$0xff]  ;;  %v279_v13 = vld [vmem:[#allocation2 + $0x4f0] sm:$0xff]  ;;  %v4315_v15 = vcombine.low %v283_v4, %v287_v5 }
  0xea   :  { %2694 = vmatprep.subr.bf16.mxu1 %v4418_v23  ;;  %v450_v23 = vld [vmem:[#allocation2 + $0xa48] sm:$0xff]  ;;  %v4353_v35 = vcombine.low %v322_v20, %v326_v22 }
  0xeb   :  { %v4481_v36 = vcombine.low %v450_v23, %v454_v24 }
  0xec   :  { %2652 = vmatpush1.bf16.msra.mxu0 %v4289_v28  ;;  %v4354_v28 = vcombine.high %v322_v20, %v326_v22  ;;  %v267_v20 = vld [vmem:[#allocation2 + $0x490] sm:$0xff] }
  0xed   :  { %2695 = vmatpush1.bf16.msra.mxu1 %v4417_v29  ;;  %2653 = vmatprep.subr.bf16.mxu0 %v4282_v30  ;;  %v4482_v29 = vcombine.high %v450_v23, %v454_v24  ;;  %v314_v30 = vld [vmem:[#allocation2 + $0x608] sm:$0xff]  ;;  %v271_v22 = vld [vmem:[#allocation2 + $0x4b0] sm:$0xff]  ;;  %v4307_v24 = vcombine.low %v275_v12, %v279_v13 }
  0xee   :  { %2696 = vmatprep.subr.bf16.mxu1 %v4410_v31  ;;  %v318_v31 = vld [vmem:[#allocation2 + $0x628] sm:$0xff] }
  0xef   :  { %v4345_v44 = vcombine.low %v314_v30, %v318_v31 }
  0xf0   :  { %2654 = vmatpush1.bf16.msra.mxu0 %v4281_v37  ;;  %v4346_v37 = vcombine.high %v314_v30, %v318_v31  ;;  %v259_v30 = vld [vmem:[#allocation2 + $0x450] sm:$0xff] }
  0xf1   :  { %2697 = vmatpush1.bf16.msra.mxu1 %v4409_v38  ;;  %2655 = vmatprep.subr.bf16.mxu0 %v4402_v40  ;;  %v4474_v38 = vcombine.high %v442_v33, %v446_v34  ;;  %v179_v40 = vld [vmem:[#allocation2 + $0x1d0] sm:$0xff]  ;;  %v4299_v34 = vcombine.low %v267_v20, %v271_v22 }
  0xf2   :  { %2698 = vmatprep.subr.bf16.mxu1 %v4530_v41  ;;  %v183_v41 = vld [vmem:[#allocation2 + $0x1f0] sm:$0xff] }
  0xf3   :  { %v4211_v52 = vcombine.low %v179_v40, %v183_v41  ;;  %v263_v31 = vld [vmem:[#allocation2 + $0x470] sm:$0xff] }
  0xf4   :  { %2656 = vmatpush2.bf16.msra.mxu0 %v4401_v46  ;;  %v4212_v46 = vcombine.high %v179_v40, %v183_v41  ;;  %v251_v40 = vld [vmem:[#allocation2 + $0x410] sm:$0xff] }
  0xf5   :  { %2699 = vmatpush2.bf16.msra.mxu1 %v4529_v47  ;;  %2657 = vmatprep.subr.bf16.mxu0 %v4394_v48  ;;  %v4340_v47 = vcombine.high %v307_v42, %v311_v43  ;;  %v171_v48 = vld [vmem:[#allocation2 + $0x190] sm:$0xff]  ;;  %v4291_v43 = vcombine.low %v259_v30, %v263_v31 }
  0xf6   :  { %2700 = vmatprep.subr.bf16.mxu1 %v4522_v49  ;;  %v175_v49 = vld [vmem:[#allocation2 + $0x1b0] sm:$0xff] }
  0xf7   :  { %v4203_v61 = vcombine.low %v171_v48, %v175_v49  ;;  %v255_v41 = vld [vmem:[#allocation2 + $0x430] sm:$0xff] }
  0xf8   :  { %2658 = vmatpush2.bf16.msra.mxu0 %v4393_v54  ;;  %v4204_v54 = vcombine.high %v171_v48, %v175_v49  ;;  %v371_v48 = vld [vmem:[#allocation2 + $0x7d0] sm:$0xff] }
  0xf9   :  { %2701 = vmatpush2.bf16.msra.mxu1 %v4521_v55  ;;  %2659 = vmatprep.subr.bf16.mxu0 %v4386_v56  ;;  %v4332_v55 = vcombine.high %v299_v50, %v303_v51  ;;  %v163_v56 = vld [vmem:[#allocation2 + $0x150] sm:$0xff]  ;;  %v4283_v51 = vcombine.low %v251_v40, %v255_v41 }
  0xfa   :  { %2702 = vmatprep.subr.bf16.mxu1 %v4514_v57  ;;  %v167_v57 = vld [vmem:[#allocation2 + $0x170] sm:$0xff] }
  0xfb   :  { %v4195_v6 = vcombine.low %v163_v56, %v167_v57  ;;  %v375_v49 = vld [vmem:[#allocation2 + $0x7f0] sm:$0xff] }
  0xfc   :  { %2660 = vmatpush2.bf16.msra.mxu0 %v4385_v0  ;;  %v4196_v0 = vcombine.high %v163_v56, %v167_v57  ;;  %v363_v56 = vld [vmem:[#allocation2 + $0x790] sm:$0xff] }
  0xfd   :  { %2703 = vmatpush2.bf16.msra.mxu1 %v4513_v1  ;;  %2661 = vmatprep.subr.bf16.mxu0 %v4378_v2  ;;  %v4324_v1 = vcombine.high %v291_v59, %v295_v60  ;;  %v155_v2 = vld [vmem:[#allocation2 + $0x110] sm:$0xff]  ;;  %v4403_v60 = vcombine.low %v371_v48, %v375_v49 }
  0xfe   :  { %2704 = vmatprep.subr.bf16.mxu1 %v4506_v3  ;;  %v159_v3 = vld [vmem:[#allocation2 + $0x130] sm:$0xff] }
  0xff   :  { %v4187_v14 = vcombine.low %v155_v2, %v159_v3  ;;  %v367_v57 = vld [vmem:[#allocation2 + $0x7b0] sm:$0xff] }
 0x100   :  { %2662 = vmatpush2.bf16.msra.mxu0 %v4377_v8  ;;  %v4188_v8 = vcombine.high %v155_v2, %v159_v3  ;;  %v355_v2 = vld [vmem:[#allocation2 + $0x750] sm:$0xff] }
 0x101   :  { %2705 = vmatpush2.bf16.msra.mxu1 %v4505_v9  ;;  %2663 = vmatprep.subr.bf16.mxu0 %v4370_v10  ;;  %v4316_v9 = vcombine.high %v283_v4, %v287_v5  ;;  %v147_v10 = vld [vmem:[#allocation2 + $0xd0] sm:$0xff]  ;;  %v4395_v5 = vcombine.low %v363_v56, %v367_v57 }
 0x102   :  { %2706 = vmatprep.subr.bf16.mxu1 %v4498_v11  ;;  %v151_v11 = vld [vmem:[#allocation2 + $0xf0] sm:$0xff] }
 0x103   :  { %v4179_v23 = vcombine.low %v147_v10, %v151_v11  ;;  %v359_v3 = vld [vmem:[#allocation2 + $0x770] sm:$0xff] }
 0x104   :  { %2664 = vmatpush2.bf16.msra.mxu0 %v4369_v16  ;;  %v4180_v16 = vcombine.high %v147_v10, %v151_v11  ;;  %v347_v10 = vld [vmem:[#allocation2 + $0x710] sm:$0xff] }
 0x105   :  { %2707 = vmatpush2.bf16.msra.mxu1 %v4497_v17  ;;  %2665 = vmatprep.subr.bf16.mxu0 %v4362_v18  ;;  %v4308_v17 = vcombine.high %v275_v12, %v279_v13  ;;  %v139_v18 = vld [vmem:[#allocation2 + $0x90] sm:$0xff]  ;;  %v4387_v13 = vcombine.low %v355_v2, %v359_v3 }
 0x106   :  { %2708 = vmatprep.subr.bf16.mxu1 %v4490_v19  ;;  %v143_v19 = vld [vmem:[#allocation2 + $0xb0] sm:$0xff] }
 0x107   :  { %v4171_v33 = vcombine.low %v139_v18, %v143_v19  ;;  %v351_v11 = vld [vmem:[#allocation2 + $0x730] sm:$0xff] }
 0x108   :  { %2666 = vmatpush2.bf16.msra.mxu0 %v4361_v26  ;;  %v4172_v26 = vcombine.high %v139_v18, %v143_v19  ;;  %v339_v18 = vld [vmem:[#allocation2 + $0x6d0] sm:$0xff] }
 0x109   :  { %2709 = vmatpush2.bf16.msra.mxu1 %v4489_v27  ;;  %2667 = vmatprep.subr.bf16.mxu0 %v4354_v28  ;;  %v4300_v27 = vcombine.high %v267_v20, %v271_v22  ;;  %v131_v28 = vld [vmem:[#allocation2 + $0x50] sm:$0xff]  ;;  %v4379_v22 = vcombine.low %v347_v10, %v351_v11 }
 0x10a   :  { %2710 = vmatprep.subr.bf16.mxu1 %v4482_v29  ;;  %v135_v29 = vld [vmem:[#allocation2 + $0x70] sm:$0xff] }
 0x10b   :  { %v4163_v42 = vcombine.low %v131_v28, %v135_v29  ;;  %v343_v19 = vld [vmem:[#allocation2 + $0x6f0] sm:$0xff] }
 0x10c   :  { %2668 = vmatpush2.bf16.msra.mxu0 %v4353_v35  ;;  %v4164_v35 = vcombine.high %v131_v28, %v135_v29  ;;  %v331_v28 = vld [vmem:[#allocation2 + $0x690] sm:$0xff] }
 0x10d   :  { %2711 = vmatpush2.bf16.msra.mxu1 %v4481_v36  ;;  %2669 = vmatprep.subr.bf16.mxu0 %v4346_v37  ;;  %v4292_v36 = vcombine.high %v259_v30, %v263_v31  ;;  %v123_v37 = vld [vmem:[#allocation2 + $0x10] sm:$0xff]  ;;  %v4371_v31 = vcombine.low %v339_v18, %v343_v19 }
 0x10e   :  { %2712 = vmatprep.subr.bf16.mxu1 %v4474_v38  ;;  %v127_v38 = vld [vmem:[#allocation2 + $0x30] sm:$0xff] }
 0x10f   :  { %v4155_v50 = vcombine.low %v123_v37, %v127_v38  ;;  %v335_v29 = vld [vmem:[#allocation2 + $0x6b0] sm:$0xff] }
 0x110   :  { %2670 = vmatpush2.bf16.msra.mxu0 %v4345_v44  ;;  %v4156_v44 = vcombine.high %v123_v37, %v127_v38  ;;  %v323_v37 = vld [vmem:[#allocation2 + $0x650] sm:$0xff] }
 0x111   :  { %2713 = vmatpush2.bf16.msra.mxu1 %v4473_v45  ;;  %2725 = vmatprep.subr.bf16.mxu0 %v4212_v46  ;;  %v4284_v45 = vcombine.high %v251_v40, %v255_v41  ;;  %v243_v46 = vld [vmem:[#allocation2 + $0x3d0] sm:$0xff]  ;;  %v507_v41 = vlaneseq }
 0x112   :  { %2768 = vmatprep.subr.bf16.mxu1 %v4340_v47  ;;  %v247_v47 = vld [vmem:[#allocation2 + $0x3f0] sm:$0xff] }
 0x113   :  { %2672 = vmatmul.mubr.bf16.vlgmr.msra.gmra.mxu0 %v5159_v25  ;;  %v4275_v59 = vcombine.low %v243_v46, %v247_v47  ;;  %v327_v38 = vld [vmem:[#allocation2 + $0x670] sm:$0xff] }
 0x114   :  { %2715 = vmatmul.mubr.bf16.vlgmr.msra.gmra.mxu1 %v5173_v39  ;;  %2726 = vmatpush1.bf16.msra.mxu0 %v4211_v52  ;;  %v4276_v52 = vcombine.high %v243_v46, %v247_v47  ;;  %v191_v46 = vld [vmem:[#allocation2 + $0x230] sm:$0xff] }
 0x115   :  { %2769 = vmatpush1.bf16.msra.mxu1 %v4339_v53  ;;  %2727 = vmatprep.subr.bf16.mxu0 %v4204_v54  ;;  %v4404_v53 = vcombine.high %v371_v48, %v375_v49  ;;  %v235_v54 = vld [vmem:[#allocation2 + $0x390] sm:$0xff] }
 0x116   :  { %2770 = vmatprep.subr.bf16.mxu1 %v4332_v55  ;;  %2757 = vmatprep.mubr.bf16.mxu0 %v5127_v58  ;;  %v239_v55 = vld [vmem:[#allocation2 + $0x3b0] sm:$0xff] }
 0x117   :  { %2800 = vmatprep.mubr.bf16.mxu1 %v5135_v63  ;;  %v4267_v4 = vcombine.low %v235_v54, %v239_v55  ;;  %v315_v47 = vld [vmem:[#allocation2 + $0x610] sm:$0xff] }
 0x118   :  { %2728 = vmatpush1.bf16.msra.mxu0 %v4203_v61  ;;  %v4268_v61 = vcombine.high %v235_v54, %v239_v55  ;;  %v319_v48 = vld [vmem:[#allocation2 + $0x630] sm:$0xff] }
 0x119   :  { %2771 = vmatpush1.bf16.msra.mxu1 %v4331_v62  ;;  %2729 = vmatprep.subr.bf16.mxu0 %v4196_v0  ;;  %v4396_v62 = vcombine.high %v363_v56, %v367_v57  ;;  %v227_v0 = vld [vmem:[#allocation2 + $0x350] sm:$0xff]  ;;  %v180_v56 = vld [vmem:[#allocation2 + $0x1d8] sm:$0xff] }
 0x11a   :  { %2772 = vmatprep.subr.bf16.mxu1 %v4324_v1  ;;  %v231_v1 = vld [vmem:[#allocation2 + $0x370] sm:$0xff]  ;;  %v184_v57 = vld [vmem:[#allocation2 + $0x1f8] sm:$0xff] }
 0x11b   :  { %v4259_v12 = vcombine.low %v227_v0, %v231_v1  ;;  %v435_v54 = vld [vmem:[#allocation2 + $0x9d0] sm:$0xff] }
 0x11c   :  { %2730 = vmatpush1.bf16.msra.mxu0 %v4195_v6  ;;  %v4260_v6 = vcombine.high %v227_v0, %v231_v1  ;;  %v439_v55 = vld [vmem:[#allocation2 + $0x9f0] sm:$0xff]  ;;  %v4214_v1 = vcombine.high %v180_v56, %v184_v57 }
 0x11d   :  { %2773 = vmatpush1.bf16.msra.mxu1 %v4323_v7  ;;  %2731 = vmatprep.subr.bf16.mxu0 %v4188_v8  ;;  %v4388_v7 = vcombine.high %v355_v2, %v359_v3  ;;  %v219_v8 = vld [vmem:[#allocation2 + $0x310] sm:$0xff]  ;;  %v4468_v0 = vcombine.high %v435_v54, %v439_v55 }
 0x11e   :  { %2774 = vmatprep.subr.bf16.mxu1 %v4316_v9  ;;  %v223_v9 = vld [vmem:[#allocation2 + $0x330] sm:$0xff] }
 0x11f   :  { %v4251_v20 = vcombine.low %v219_v8, %v223_v9  ;;  %v427_v2 = vld [vmem:[#allocation2 + $0x990] sm:$0xff] }
 0x120   :  { %2732 = vmatpush1.bf16.msra.mxu0 %v4187_v14  ;;  %v4252_v14 = vcombine.high %v219_v8, %v223_v9  ;;  %v431_v3 = vld [vmem:[#allocation2 + $0x9b0] sm:$0xff]  ;;  %v4213_v8 = vcombine.low %v180_v56, %v184_v57 }
 0x121   :  { %2775 = vmatpush1.bf16.msra.mxu1 %v4315_v15  ;;  %2733 = vmatprep.subr.bf16.mxu0 %v4180_v16  ;;  %v4380_v15 = vcombine.high %v347_v10, %v351_v11  ;;  %v211_v16 = vld [vmem:[#allocation2 + $0x2d0] sm:$0xff]  ;;  %v4460_v9 = vcombine.high %v427_v2, %v431_v3 }
 0x122   :  { %2776 = vmatprep.subr.bf16.mxu1 %v4308_v17  ;;  %v215_v17 = vld [vmem:[#allocation2 + $0x2f0] sm:$0xff] }
 0x123   :  { %v4243_v30 = vcombine.low %v211_v16, %v215_v17  ;;  %v419_v11 = vld [vmem:[#allocation2 + $0x950] sm:$0xff] }
 0x124   :  { %2734 = vmatpush1.bf16.msra.mxu0 %v4179_v23  ;;  %v4244_v23 = vcombine.high %v211_v16, %v215_v17  ;;  %v387_v57 = vld [vmem:[#allocation2 + $0x850] sm:$0xff] }
 0x125   :  { %2777 = vmatpush1.bf16.msra.mxu1 %v4307_v24  ;;  %2735 = vmatprep.subr.bf16.mxu0 %v4172_v26  ;;  %v4372_v24 = vcombine.high %v339_v18, %v343_v19  ;;  %v203_v26 = vld [vmem:[#allocation2 + $0x290] sm:$0xff]  ;;  %v4459_v18 = vcombine.low %v427_v2, %v431_v3 }
 0x126   :  { %2778 = vmatprep.subr.bf16.mxu1 %v4300_v27  ;;  %v207_v27 = vld [vmem:[#allocation2 + $0x2b0] sm:$0xff] }
 0x127   :  { %v4235_v40 = vcombine.low %v203_v26, %v207_v27 }
 0x128   :  { %2736 = vmatpush1.bf16.msra.mxu0 %v4171_v33  ;;  %v4236_v33 = vcombine.high %v203_v26, %v207_v27  ;;  %v411_v27 = vld [vmem:[#allocation2 + $0x910] sm:$0xff] }
 0x129   :  { %2779 = vmatpush1.bf16.msra.mxu1 %v4299_v34  ;;  %2737 = vmatprep.subr.bf16.mxu0 %v4164_v35  ;;  %v4364_v34 = vcombine.high %v331_v28, %v335_v29  ;;  %v195_v35 = vld [vmem:[#allocation2 + $0x250] sm:$0xff] }
 0x12a   :  { %2780 = vmatprep.subr.bf16.mxu1 %v4292_v36  ;;  %v199_v36 = vld [vmem:[#allocation2 + $0x270] sm:$0xff] }
 0x12b   :  { %v4227_v49 = vcombine.low %v195_v35, %v199_v36 }
 0x12c   :  { %2738 = vmatpush1.bf16.msra.mxu0 %v4163_v42  ;;  %v4363_v42 = vcombine.low %v331_v28, %v335_v29  ;;  %v415_v28 = vld [vmem:[#allocation2 + $0x930] sm:$0xff] }
 0x12d   :  { %2781 = vmatpush1.bf16.msra.mxu1 %v4291_v43  ;;  %2739 = vmatprep.subr.bf16.mxu0 %v4156_v44  ;;  %v4228_v43 = vcombine.high %v195_v35, %v199_v36  ;;  %v4356_v44 = vcombine.high %v323_v37, %v327_v38 }
 0x12e   :  { %2782 = vmatprep.subr.bf16.mxu1 %v4284_v45  ;;  %v187_v45 = vld [vmem:[#allocation2 + $0x210] sm:$0xff] }
 0x130   :  { %2740 = vmatpush1.bf16.msra.mxu0 %v4155_v50  ;;  %v5183_v50 = vshrl.u32 %v507_v41, 7  ;;  %v403_v41 = vld [vmem:[#allocation2 + $0x8d0] sm:$0xff] }
 0x131   :  { %2783 = vmatpush1.bf16.msra.mxu1 %v4283_v51  ;;  %2741 = vmatprep.subr.bf16.mxu0 %v4276_v52  ;;  %v4355_v51 = vcombine.low %v323_v37, %v327_v38  ;;  %v4220_v52 = vcombine.high %v187_v45, %v191_v46  ;;  %v4444_v37 = vcombine.high %v411_v27, %v415_v28 }
 0x132   :  { %2784 = vmatprep.subr.bf16.mxu1 %v4404_v53  ;;  %v4348_v53 = vcombine.high %v315_v47, %v319_v48 }
 0x134   :  { %2742 = vmatpush2.bf16.msra.mxu0 %v4275_v59  ;;  %v4219_v59 = vcombine.low %v187_v45, %v191_v46  ;;  %v4443_v45 = vcombine.low %v411_v27, %v415_v28  ;;  %v495_v27 = vld [vmem:[#allocation2 + $0xbb0] sm:$0xff]  ;;  %v236_v28 = vld [vmem:[#allocation2 + $0x398] sm:$0xff] }
 0x135   :  { %2785 = vmatpush2.bf16.msra.mxu1 %v4403_v60  ;;  %2743 = vmatprep.subr.bf16.mxu0 %v4268_v61  ;;  %v509_v60 = vsub.s32 0, %v5183_v50  ;;  %v4347_v61 = vcombine.low %v315_v47, %v319_v48  ;;  %v395_v48 = vld [vmem:[#allocation2 + $0x890] sm:$0xff] }
 0x136   :  { %2786 = vmatprep.subr.bf16.mxu1 %v4396_v62  ;;  %v5186_v62 = vld [vmem:[#allocation4] sm:$0xff] }
 0x138   :  { %2744 = vmatpush2.bf16.msra.mxu0 %v4267_v4  ;;  %v172_v4 = vld [vmem:[#allocation2 + $0x198] sm:$0xff] }
 0x139   :  { %2787 = vmatpush2.bf16.msra.mxu1 %v4395_v5  ;;  %2745 = vmatprep.subr.bf16.mxu0 %v4260_v6  ;;  %v176_v5 = vld [vmem:[#allocation2 + $0x1b8] sm:$0xff]  ;;  %v510_v6 = vrot.slane %v5186_v62, %v509_v60 }
 0x13a   :  { %2788 = vmatprep.subr.bf16.mxu1 %v4388_v7  ;;  %v4467_v7 = vcombine.low %v435_v54, %v439_v55  ;;  %v4206_v10 = vcombine.high %v172_v4, %v176_v5 }
 0x13c   :  { %2746 = vmatpush2.bf16.msra.mxu0 %v4259_v12  ;;  %v423_v12 = vld [vmem:[#allocation2 + $0x970] sm:$0xff] }
 0x13d   :  { %2789 = vmatpush2.bf16.msra.mxu1 %v4387_v13  ;;  %2747 = vmatprep.subr.bf16.mxu0 %v4252_v14  ;;  %v164_v14 = vld [vmem:[#allocation2 + $0x158] sm:$0xff] }
 0x13e   :  { %2790 = vmatprep.subr.bf16.mxu1 %v4380_v15  ;;  %v168_v15 = vld [vmem:[#allocation2 + $0x178] sm:$0xff] }
 0x13f   :  { %v4198_v26 = vcombine.high %v164_v14, %v168_v15  ;;  %v4197_v36 = vcombine.low %v164_v14, %v168_v15  ;;  %v503_v14 = vld [vmem:[#allocation2 + $0xbf0] sm:$0xff]  ;;  %v244_v15 = vld [vmem:[#allocation2 + $0x3d8] sm:$0xff] }
 0x140   :  { %2748 = vmatpush2.bf16.msra.mxu0 %v4251_v20  ;;  %v4205_v20 = vcombine.low %v172_v4, %v176_v5  ;;  %v379_v5 = vld [vmem:[#allocation2 + $0x810] sm:$0xff] }
 0x141   :  { %2791 = vmatpush2.bf16.msra.mxu1 %v4379_v22  ;;  %2749 = vmatprep.subr.bf16.mxu0 %v4244_v23  ;;  %v4452_v22 = vcombine.high %v419_v11, %v423_v12 }
 0x142   :  { %2792 = vmatprep.subr.bf16.mxu1 %v4372_v24 }
 0x144   :  { %2750 = vmatpush2.bf16.msra.mxu0 %v4243_v30  ;;  %v156_v30 = vld [vmem:[#allocation2 + $0x118] sm:$0xff] }
 0x145   :  { %2793 = vmatpush2.bf16.msra.mxu1 %v4371_v31  ;;  %2751 = vmatprep.subr.bf16.mxu0 %v4236_v33  ;;  %v160_v31 = vld [vmem:[#allocation2 + $0x138] sm:$0xff] }
 0x146   :  { %2794 = vmatprep.subr.bf16.mxu1 %v4364_v34  ;;  %v4451_v34 = vcombine.low %v419_v11, %v423_v12 }
 0x148   :  { %2752 = vmatpush2.bf16.msra.mxu0 %v4235_v40  ;;  %v4190_v40 = vcombine.high %v156_v30, %v160_v31 }
 0x149   :  { %2795 = vmatpush2.bf16.msra.mxu1 %v4363_v42  ;;  %2753 = vmatprep.subr.bf16.mxu0 %v4228_v43  ;;  %v407_v42 = vld [vmem:[#allocation2 + $0x8f0] sm:$0xff]  ;;  %v148_v43 = vld [vmem:[#allocation2 + $0xd8] sm:$0xff] }
 0x14a   :  { %2796 = vmatprep.subr.bf16.mxu1 %v4356_v44  ;;  %v152_v44 = vld [vmem:[#allocation2 + $0xf8] sm:$0xff]  ;;  %v4436_v46 = vcombine.high %v403_v41, %v407_v42 }
 0x14b   :  { %v4182_v47 = vcombine.high %v148_v43, %v152_v44  ;;  %v4181_v54 = vcombine.low %v148_v43, %v152_v44 }
 0x14c   :  { %2754 = vmatpush2.bf16.msra.mxu0 %v4227_v49  ;;  %v399_v49 = vld [vmem:[#allocation2 + $0x8b0] sm:$0xff] }
 0x14d   :  { %2797 = vmatpush2.bf16.msra.mxu1 %v4355_v51  ;;  %2755 = vmatprep.subr.bf16.mxu0 %v4220_v52  ;;  %v140_v51 = vld [vmem:[#allocation2 + $0x98] sm:$0xff]  ;;  %v4428_v55 = vcombine.high %v395_v48, %v399_v49 }
 0x14e   :  { %2798 = vmatprep.subr.bf16.mxu1 %v4348_v53  ;;  %v144_v52 = vld [vmem:[#allocation2 + $0xb8] sm:$0xff]  ;;  %v4435_v53 = vcombine.low %v403_v41, %v407_v42 }
 0x14f   :  { %v4174_v56 = vcombine.high %v140_v51, %v144_v52  ;;  %v4173_v2 = vcombine.low %v140_v51, %v144_v52 }
 0x150   :  { %2756 = vmatpush2.bf16.msra.mxu0 %v4219_v59  ;;  %v391_v59 = vld [vmem:[#allocation2 + $0x870] sm:$0xff] }
 0x151   :  { %2799 = vmatpush2.bf16.msra.mxu1 %v4347_v61  ;;  %2811 = vmatprep.subr.bf16.mxu0 %v4468_v0  ;;  %v132_v61 = vld [vmem:[#allocation2 + $0x58] sm:$0xff]  ;;  %v4420_v3 = vcombine.high %v387_v57, %v391_v59 }
 0x152   :  { %2854 = vmatprep.subr.bf16.mxu1 %v4214_v1  ;;  %v136_v0 = vld [vmem:[#allocation2 + $0x78] sm:$0xff]  ;;  %v4427_v1 = vcombine.low %v395_v48, %v399_v49 }
 0x153   :  { %v2501_v13 = vpop.f32.mrf.mxu0  ;;  %2758 = vmatmul.mubr.bf16.vlgmr.msra.gmra.mxu0 %v5151_v21  ;;  %v4166_v4 = vcombine.high %v132_v61, %v136_v0 }
 0x154   :  { %v2502_v16 = vadd.f32 %v2501_v13, %v510_v6  ;;  %v2544_v17 = vpop.f32.mrf.mxu1  ;;  %2801 = vmatmul.mubr.bf16.vlgmr.msra.gmra.mxu1 %v5159_v25  ;;  %2812 = vmatpush1.bf16.msra.mxu0 %v4467_v7  ;;  %v124_v7 = vld [vmem:[#allocation2 + $0x18] sm:$0xff]  ;;  %v499_v13 = vld [vmem:[#allocation2 + $0xbd0] sm:$0xff] }
 0x155   :  { %2855 = vmatpush1.bf16.msra.mxu1 %v4213_v8  ;;  %v5193_v19 = vpop.f32.mrf.mxu0  ;;  %2813 = vmatprep.subr.bf16.mxu0 %v4460_v9  ;;  %v128_v8 = vld [vmem:[#allocation2 + $0x38] sm:$0xff]  ;;  %v4419_v9 = vcombine.low %v387_v57, %v391_v59 }
 0x156   :  { %v5195_v23 = vadd.f32 %v2544_v17, %v2502_v16  ;;  %v5197_v24 = vpop.f32.mrf.mxu1  ;;  %2856 = vmatprep.subr.bf16.mxu1 %v4206_v10  ;;  %2843 = vmatprep.mubr.bf16.mxu0 %v5161_v32  ;;  %v4165_v10 = vcombine.low %v132_v61, %v136_v0  ;;  %v4158_v12 = vcombine.high %v124_v7, %v128_v8  ;;  %v248_v16 = vld [vmem:[#allocation2 + $0x3f8] sm:$0xff] }
 0x157   :  { %v2505_v29 = vpop.f32.mrf.mxu0  ;;  %2886 = vmatprep.mubr.bf16.mxu1 %v5127_v58  ;;  %v4189_v58 = vcombine.low %v156_v30, %v160_v31  ;;  %v4531_v30 = vcombine.low %v499_v13, %v503_v14  ;;  %v4277_v31 = vcombine.low %v244_v15, %v248_v16 }
 0x158   :  { %v2506_v33 = vadd.f32 %v2505_v29, %v510_v6  ;;  %2814 = vmatpush1.bf16.msra.mxu0 %v4459_v18  ;;  %v2548_v35 = vpop.f32.mrf.mxu1  ;;  %v383_v6 = vld [vmem:[#allocation2 + $0x830] sm:$0xff]  ;;  %v4157_v18 = vcombine.low %v124_v7, %v128_v8  ;;  %v240_v29 = vld [vmem:[#allocation2 + $0x3b8] sm:$0xff] }
 0x159   :  { %2857 = vmatpush1.bf16.msra.mxu1 %v4205_v20  ;;  %2815 = vmatprep.subr.bf16.mxu0 %v4452_v22  ;;  %v4412_v11 = vcombine.high %v379_v5, %v383_v6  ;;  %v4411_v17 = vcombine.low %v379_v5, %v383_v6  ;;  %v4532_v20 = vcombine.high %v499_v13, %v503_v14 }
 0x15a   :  { %v5201_v38 = vadd.f32 %v2548_v35, %v2506_v33  ;;  %2858 = vmatprep.subr.bf16.mxu1 %v4198_v26  ;;  %v4278_v22 = vcombine.high %v244_v15, %v248_v16  ;;  %v491_v26 = vld [vmem:[#allocation2 + $0xb90] sm:$0xff]  ;;  %v4269_v42 = vcombine.low %v236_v28, %v240_v29 }
 0x15b   :  { %v4524_v33 = vcombine.high %v491_v26, %v495_v27  ;;  %v483_v35 = vld [vmem:[#allocation2 + $0xb50] sm:$0xff]  ;;  %v4523_v41 = vcombine.low %v491_v26, %v495_v27 }
 0x15c   :  { %2816 = vmatpush1.bf16.msra.mxu0 %v4451_v34  ;;  %v4270_v34 = vcombine.high %v236_v28, %v240_v29 }
 0x15d   :  { %2859 = vmatpush1.bf16.msra.mxu1 %v4197_v36  ;;  %2817 = vmatprep.subr.bf16.mxu0 %v4444_v37  ;;  %v487_v36 = vld [vmem:[#allocation2 + $0xb70] sm:$0xff]  ;;  %v228_v37 = vld [vmem:[#allocation2 + $0x358] sm:$0xff] }
 0x15e   :  { %2860 = vmatprep.subr.bf16.mxu1 %v4190_v40  ;;  %v232_v40 = vld [vmem:[#allocation2 + $0x378] sm:$0xff]  ;;  %v4516_v43 = vcombine.high %v483_v35, %v487_v36  ;;  %v4515_v48 = vcombine.low %v483_v35, %v487_v36 }
 0x15f   :  { %v4262_v44 = vcombine.high %v228_v37, %v232_v40  ;;  %v4261_v49 = vcombine.low %v228_v37, %v232_v40 }
 0x160   :  { %2818 = vmatpush1.bf16.msra.mxu0 %v4443_v45  ;;  %v475_v45 = vld [vmem:[#allocation2 + $0xb10] sm:$0xff] }
 0x161   :  { %2861 = vmatpush1.bf16.msra.mxu1 %v4189_v58  ;;  %2819 = vmatprep.subr.bf16.mxu0 %v4436_v46  ;;  %v479_v58 = vld [vmem:[#allocation2 + $0xb30] sm:$0xff]  ;;  %v220_v46 = vld [vmem:[#allocation2 + $0x318] sm:$0xff] }
 0x162   :  { %2862 = vmatprep.subr.bf16.mxu1 %v4182_v47  ;;  %v224_v47 = vld [vmem:[#allocation2 + $0x338] sm:$0xff]  ;;  %v4508_v51 = vcombine.high %v475_v45, %v479_v58  ;;  %v4507_v57 = vcombine.low %v475_v45, %v479_v58  ;;  %v5203_v58 = vpop.f32.mrf.mxu0 }
 0x163   :  { %v4254_v52 = vcombine.high %v220_v46, %v224_v47  ;;  %v4253_v59 = vcombine.low %v220_v46, %v224_v47 }
 0x164   :  { %2820 = vmatpush1.bf16.msra.mxu0 %v4435_v53  ;;  %v467_v53 = vld [vmem:[#allocation2 + $0xad0] sm:$0xff] }
 0x165   :  { %2863 = vmatpush1.bf16.msra.mxu1 %v4181_v54  ;;  %2821 = vmatprep.subr.bf16.mxu0 %v4428_v55  ;;  %v471_v54 = vld [vmem:[#allocation2 + $0xaf0] sm:$0xff]  ;;  %v212_v55 = vld [vmem:[#allocation2 + $0x2d8] sm:$0xff] }
 0x166   :  { %2864 = vmatprep.subr.bf16.mxu1 %v4174_v56  ;;  %v216_v56 = vld [vmem:[#allocation2 + $0x2f8] sm:$0xff]  ;;  %v4500_v61 = vcombine.high %v467_v53, %v471_v54  ;;  %v4499_v5 = vcombine.low %v467_v53, %v471_v54 }
 0x167   :  { %v4246_v0 = vcombine.high %v212_v55, %v216_v56  ;;  %v4245_v6 = vcombine.low %v212_v55, %v216_v56  ;;  %v420_v53 = vld [vmem:[#allocation2 + $0x958] sm:$0xff] }
 0x168   :  { %2822 = vmatpush1.bf16.msra.mxu0 %v4427_v1  ;;  %v459_v1 = vld [vmem:[#allocation2 + $0xa90] sm:$0xff]  ;;  %v424_v54 = vld [vmem:[#allocation2 + $0x978] sm:$0xff] }
 0x169   :  { %2865 = vmatpush1.bf16.msra.mxu1 %v4173_v2  ;;  %2823 = vmatprep.subr.bf16.mxu0 %v4420_v3  ;;  %v463_v2 = vld [vmem:[#allocation2 + $0xab0] sm:$0xff]  ;;  %v204_v3 = vld [vmem:[#allocation2 + $0x298] sm:$0xff] }
 0x16a   :  { %2866 = vmatprep.subr.bf16.mxu1 %v4166_v4  ;;  %v208_v4 = vld [vmem:[#allocation2 + $0x2b8] sm:$0xff]  ;;  %v4492_v7 = vcombine.high %v459_v1, %v463_v2  ;;  %v4491_v13 = vcombine.low %v459_v1, %v463_v2 }
 0x16b   :  { %v4238_v8 = vcombine.high %v204_v3, %v208_v4  ;;  %v4237_v14 = vcombine.low %v204_v3, %v208_v4  ;;  %v284_v1 = vld [vmem:[#allocation2 + $0x518] sm:$0xff] }
 0x16c   :  { %2824 = vmatpush1.bf16.msra.mxu0 %v4419_v9  ;;  %v451_v9 = vld [vmem:[#allocation2 + $0xa50] sm:$0xff]  ;;  %v288_v2 = vld [vmem:[#allocation2 + $0x538] sm:$0xff] }
 0x16d   :  { %2867 = vmatpush1.bf16.msra.mxu1 %v4165_v10  ;;  %2825 = vmatprep.subr.bf16.mxu0 %v4412_v11  ;;  %v455_v10 = vld [vmem:[#allocation2 + $0xa70] sm:$0xff]  ;;  %v196_v11 = vld [vmem:[#allocation2 + $0x258] sm:$0xff] }
 0x16e   :  { %2868 = vmatprep.subr.bf16.mxu1 %v4158_v12  ;;  %v200_v12 = vld [vmem:[#allocation2 + $0x278] sm:$0xff]  ;;  %v4484_v15 = vcombine.high %v451_v9, %v455_v10  ;;  %v4483_v26 = vcombine.low %v451_v9, %v455_v10 }
 0x16f   :  { %v4230_v16 = vcombine.high %v196_v11, %v200_v12  ;;  %v4229_v27 = vcombine.low %v196_v11, %v200_v12  ;;  %v412_v4 = vld [vmem:[#allocation2 + $0x918] sm:$0xff] }
 0x170   :  { %2826 = vmatpush1.bf16.msra.mxu0 %v4411_v17  ;;  %v443_v17 = vld [vmem:[#allocation2 + $0xa10] sm:$0xff]  ;;  %v276_v11 = vld [vmem:[#allocation2 + $0x4d8] sm:$0xff] }
 0x171   :  { %2869 = vmatpush1.bf16.msra.mxu1 %v4157_v18  ;;  %2827 = vmatprep.subr.bf16.mxu0 %v4532_v20  ;;  %v447_v18 = vld [vmem:[#allocation2 + $0xa30] sm:$0xff]  ;;  %v188_v20 = vld [vmem:[#allocation2 + $0x218] sm:$0xff] }
 0x172   :  { %2870 = vmatprep.subr.bf16.mxu1 %v4278_v22  ;;  %v192_v22 = vld [vmem:[#allocation2 + $0x238] sm:$0xff]  ;;  %v4476_v28 = vcombine.high %v443_v17, %v447_v18  ;;  %v4475_v35 = vcombine.low %v443_v17, %v447_v18 }
 0x173   :  { %v4222_v29 = vcombine.high %v188_v20, %v192_v22  ;;  %v4221_v36 = vcombine.low %v188_v20, %v192_v22  ;;  %v280_v12 = vld [vmem:[#allocation2 + $0x4f8] sm:$0xff] }
 0x174   :  { %2828 = vmatpush2.bf16.msra.mxu0 %v4531_v30  ;;  %v308_v30 = vld [vmem:[#allocation2 + $0x5d8] sm:$0xff] }
 0x175   :  { %2871 = vmatpush2.bf16.msra.mxu1 %v4277_v31  ;;  %2829 = vmatprep.subr.bf16.mxu0 %v4524_v33  ;;  %v312_v31 = vld [vmem:[#allocation2 + $0x5f8] sm:$0xff] }
 0x176   :  { %2872 = vmatprep.subr.bf16.mxu1 %v4270_v34  ;;  %v436_v33 = vld [vmem:[#allocation2 + $0x9d8] sm:$0xff]  ;;  %v4342_v37 = vcombine.high %v308_v30, %v312_v31  ;;  %v4341_v45 = vcombine.low %v308_v30, %v312_v31 }
 0x177   :  { %v440_v34 = vld [vmem:[#allocation2 + $0x9f8] sm:$0xff] }
 0x178   :  { %2830 = vmatpush2.bf16.msra.mxu0 %v4523_v41  ;;  %v4470_v40 = vcombine.high %v436_v33, %v440_v34  ;;  %v300_v41 = vld [vmem:[#allocation2 + $0x598] sm:$0xff]  ;;  %v4469_v46 = vcombine.low %v436_v33, %v440_v34 }
 0x179   :  { %2873 = vmatpush2.bf16.msra.mxu1 %v4269_v42  ;;  %2831 = vmatprep.subr.bf16.mxu0 %v4516_v43  ;;  %v304_v42 = vld [vmem:[#allocation2 + $0x5b8] sm:$0xff] }
 0x17a   :  { %2874 = vmatprep.subr.bf16.mxu1 %v4262_v44  ;;  %v428_v43 = vld [vmem:[#allocation2 + $0x998] sm:$0xff]  ;;  %v4334_v47 = vcombine.high %v300_v41, %v304_v42  ;;  %v4333_v56 = vcombine.low %v300_v41, %v304_v42 }
 0x17b   :  { %v432_v44 = vld [vmem:[#allocation2 + $0x9b8] sm:$0xff] }
 0x17c   :  { %2832 = vmatpush2.bf16.msra.mxu0 %v4515_v48  ;;  %v4462_v48 = vcombine.high %v428_v43, %v432_v44  ;;  %v268_v17 = vld [vmem:[#allocation2 + $0x498] sm:$0xff] }
 0x17d   :  { %2875 = vmatpush2.bf16.msra.mxu1 %v4261_v49  ;;  %2833 = vmatprep.subr.bf16.mxu0 %v4508_v51  ;;  %v292_v49 = vld [vmem:[#allocation2 + $0x558] sm:$0xff] }
 0x17e   :  { %2876 = vmatprep.subr.bf16.mxu1 %v4254_v52  ;;  %v296_v51 = vld [vmem:[#allocation2 + $0x578] sm:$0xff] }
 0x17f   :  { %v272_v18 = vld [vmem:[#allocation2 + $0x4b8] sm:$0xff] }
 0x180   :  { %2834 = vmatpush2.bf16.msra.mxu0 %v4507_v57  ;;  %v396_v20 = vld [vmem:[#allocation2 + $0x898] sm:$0xff] }
 0x181   :  { %2877 = vmatpush2.bf16.msra.mxu1 %v4253_v59  ;;  %2835 = vmatprep.subr.bf16.mxu0 %v4500_v61  ;;  %v4461_v59 = vcombine.low %v428_v43, %v432_v44  ;;  %v4326_v61 = vcombine.high %v292_v49, %v296_v51  ;;  %v400_v22 = vld [vmem:[#allocation2 + $0x8b8] sm:$0xff] }
 0x182   :  { %2878 = vmatprep.subr.bf16.mxu1 %v4246_v0  ;;  %v4454_v0 = vcombine.high %v420_v53, %v424_v54  ;;  %v260_v30 = vld [vmem:[#allocation2 + $0x458] sm:$0xff] }
 0x183   :  { %v264_v31 = vld [vmem:[#allocation2 + $0x478] sm:$0xff] }
 0x184   :  { %2836 = vmatpush2.bf16.msra.mxu0 %v4499_v5  ;;  %v416_v5 = vld [vmem:[#allocation2 + $0x938] sm:$0xff] }
 0x185   :  { %2879 = vmatpush2.bf16.msra.mxu1 %v4245_v6  ;;  %2837 = vmatprep.subr.bf16.mxu0 %v4492_v7  ;;  %v4453_v6 = vcombine.low %v420_v53, %v424_v54  ;;  %v4318_v7 = vcombine.high %v284_v1, %v288_v2  ;;  %v4446_v10 = vcombine.high %v412_v4, %v416_v5  ;;  %v388_v33 = vld [vmem:[#allocation2 + $0x858] sm:$0xff] }
 0x186   :  { %2880 = vmatprep.subr.bf16.mxu1 %v4238_v8  ;;  %v392_v34 = vld [vmem:[#allocation2 + $0x878] sm:$0xff] }
 0x187   :  { %v252_v41 = vld [vmem:[#allocation2 + $0x418] sm:$0xff] }
 0x188   :  { %2838 = vmatpush2.bf16.msra.mxu0 %v4491_v13  ;;  %v408_v13 = vld [vmem:[#allocation2 + $0x8f8] sm:$0xff] }
 0x189   :  { %2881 = vmatpush2.bf16.msra.mxu1 %v4237_v14  ;;  %2839 = vmatprep.subr.bf16.mxu0 %v4484_v15  ;;  %v4310_v15 = vcombine.high %v276_v11, %v280_v12  ;;  %v256_v42 = vld [vmem:[#allocation2 + $0x438] sm:$0xff] }
 0x18a   :  { %2882 = vmatprep.subr.bf16.mxu1 %v4230_v16  ;;  %v380_v43 = vld [vmem:[#allocation2 + $0x818] sm:$0xff]  ;;  %v4285_v54 = vcombine.low %v252_v41, %v256_v42 }
 0x18b   :  { %v384_v44 = vld [vmem:[#allocation2 + $0x838] sm:$0xff] }
 0x18c   :  { %2840 = vmatpush2.bf16.msra.mxu0 %v4483_v26  ;;  %v4309_v26 = vcombine.low %v276_v11, %v280_v12  ;;  %v504_v53 = vld [vmem:[#allocation2 + $0xbf8] sm:$0xff] }
 0x18d   :  { %2883 = vmatpush2.bf16.msra.mxu1 %v4229_v27  ;;  %2841 = vmatprep.subr.bf16.mxu0 %v4476_v28  ;;  %v4302_v28 = vcombine.high %v268_v17, %v272_v18 }
 0x18e   :  { %2884 = vmatprep.subr.bf16.mxu1 %v4222_v29  ;;  %v4430_v29 = vcombine.high %v396_v20, %v400_v22 }
 0x190   :  { %2842 = vmatpush2.bf16.msra.mxu0 %v4475_v35  ;;  %v4301_v35 = vcombine.low %v268_v17, %v272_v18 }
 0x191   :  { %2885 = vmatpush2.bf16.msra.mxu1 %v4221_v36  ;;  %2897 = vmatprep.subr.bf16.mxu0 %v4342_v37  ;;  %v4429_v36 = vcombine.low %v396_v20, %v400_v22  ;;  %v4294_v37 = vcombine.high %v260_v30, %v264_v31  ;;  %v340_v20 = vld [vmem:[#allocation2 + $0x6d8] sm:$0xff] }
 0x192   :  { %2940 = vmatprep.subr.bf16.mxu1 %v4470_v40  ;;  %v4422_v40 = vcombine.high %v388_v33, %v392_v34  ;;  %v344_v22 = vld [vmem:[#allocation2 + $0x6f8] sm:$0xff] }
 0x193   :  { %v2587_v52 = vpop.f32.mrf.mxu0  ;;  %2844 = vmatmul.mubr.bf16.vlgmr.msra.gmra.mxu0 %v5173_v39 }
 0x194   :  { %v2588_v55 = vadd.f32 %v2587_v52, %v5195_v23  ;;  %2887 = vmatmul.mubr.bf16.vlgmr.msra.gmra.mxu1 %v5151_v21  ;;  %2898 = vmatpush1.bf16.msra.mxu0 %v4341_v45  ;;  %v4325_v23 = vcombine.low %v292_v49, %v296_v51  ;;  %v4293_v45 = vcombine.low %v260_v30, %v264_v31  ;;  %v372_v49 = vld [vmem:[#allocation2 + $0x7d8] sm:$0xff] }
 0x195   :  { %2941 = vmatpush1.bf16.msra.mxu1 %v4469_v46  ;;  %v5208_v57 = vpop.f32.mrf.mxu0  ;;  %2899 = vmatprep.subr.bf16.mxu0 %v4334_v47  ;;  %v4421_v46 = vcombine.low %v388_v33, %v392_v34  ;;  %v4286_v47 = vcombine.high %v252_v41, %v256_v42  ;;  %v376_v51 = vld [vmem:[#allocation2 + $0x7f8] sm:$0xff]  ;;  %v4374_v30 = vcombine.high %v340_v20, %v344_v22 }
 0x196   :  { %2942 = vmatprep.subr.bf16.mxu1 %v4462_v48  ;;  %2929 = vmatprep.mubr.bf16.mxu0 %v5135_v63  ;;  %v2983_v8 = vmax.f32 %v2588_v55, 0.0  ;;  %v404_v63 = vld [vmem:[#allocation2 + $0x8d8] sm:$0xff]  ;;  %v4414_v48 = vcombine.high %v380_v43, %v384_v44  ;;  %v4413_v55 = vcombine.low %v380_v43, %v384_v44 }
 0x197   :  { %v2591_v3 = vpop.f32.mrf.mxu0  ;;  %2972 = vmatprep.mubr.bf16.mxu1 %v5161_v32  ;;  %v4317_v32 = vcombine.low %v284_v1, %v288_v2  ;;  %v4438_v16 = vcombine.high %v404_v63, %v408_v13  ;;  %v4437_v27 = vcombine.low %v404_v63, %v408_v13  ;;  %v500_v52 = vld [vmem:[#allocation2 + $0xbd8] sm:$0xff] }
 0x198   :  { %v2592_v21 = vadd.f32 %v2591_v3, %v5201_v38  ;;  %2900 = vmatpush1.bf16.msra.mxu0 %v4333_v56  ;;  %v4445_v38 = vcombine.low %v412_v4, %v416_v5  ;;  %v4406_v56 = vcombine.high %v372_v49, %v376_v51  ;;  %v492_v1 = vld [vmem:[#allocation2 + $0xb98] sm:$0xff]  ;;  %v4405_v3 = vcombine.low %v372_v49, %v376_v51  ;;  %v2550_v49 = vpop.f32.mrf.mxu1 }
 0x199   :  { %2943 = vmatpush1.bf16.msra.mxu1 %v4461_v59  ;;  %2901 = vmatprep.subr.bf16.mxu0 %v4326_v61  ;;  %v4534_v59 = vcombine.high %v500_v52, %v504_v53  ;;  %v364_v61 = vld [vmem:[#allocation2 + $0x798] sm:$0xff]  ;;  %v4533_v4 = vcombine.low %v500_v52, %v504_v53 }
 0x19a   :  { %v2991_v9 = vmax.f32 %v2592_v21, 0.0  ;;  %2944 = vmatprep.subr.bf16.mxu1 %v4454_v0  ;;  %v368_v0 = vld [vmem:[#allocation2 + $0x7b8] sm:$0xff] }
 0x19b   :  { %v496_v2 = vld [vmem:[#allocation2 + $0xbb8] sm:$0xff]  ;;  %v4398_v5 = vcombine.high %v364_v61, %v368_v0 }
 0x19c   :  { %v5213_v14 = vpack.c.bf16 %v2991_v9, %v2983_v8  ;;  %2902 = vmatpush1.bf16.msra.mxu0 %v4325_v23  ;;  %v4526_v21 = vcombine.high %v492_v1, %v496_v2  ;;  %v356_v23 = vld [vmem:[#allocation2 + $0x758] sm:$0xff]  ;;  %v4397_v9 = vcombine.low %v364_v61, %v368_v0 }
 0x19d   :  { %2945 = vmatpush1.bf16.msra.mxu1 %v4453_v6  ;;  %2903 = vmatprep.subr.bf16.mxu0 %v4318_v7  ;;  %v360_v6 = vld [vmem:[#allocation2 + $0x778] sm:$0xff] }
 0x19e   :  { %2946 = vmatprep.subr.bf16.mxu1 %v4446_v10  ;;  %v484_v7 = vld [vmem:[#allocation2 + $0xb58] sm:$0xff]  ;;  %v4525_v10 = vcombine.low %v492_v1, %v496_v2  ;;  %v4390_v11 = vcombine.high %v356_v23, %v360_v6 }
 0x19f   :  { %v488_v8 = vld [vmem:[#allocation2 + $0xb78] sm:$0xff] }
 0x1a0   :  { %2904 = vmatpush1.bf16.msra.mxu0 %v4317_v32  ;;  %v4518_v12 = vcombine.high %v484_v7, %v488_v8  ;;  %v348_v63 = vld [vmem:[#allocation2 + $0x718] sm:$0xff] }
 0x1a1   :  { %2947 = vmatpush1.bf16.msra.mxu1 %v4445_v38  ;;  %2905 = vmatprep.subr.bf16.mxu0 %v4310_v15  ;;  %v352_v13 = vld [vmem:[#allocation2 + $0x738] sm:$0xff]  ;;  %v4389_v15 = vcombine.low %v356_v23, %v360_v6 }
 0x1a2   :  { %2948 = vmatprep.subr.bf16.mxu1 %v4438_v16  ;;  %v476_v32 = vld [vmem:[#allocation2 + $0xb18] sm:$0xff]  ;;  %v4517_v16 = vcombine.low %v484_v7, %v488_v8  ;;  %v4382_v17 = vcombine.high %v348_v63, %v352_v13 }
 0x1a3   :  { %v480_v38 = vld [vmem:[#allocation2 + $0xb38] sm:$0xff] }
 0x1a4   :  { %2906 = vmatpush1.bf16.msra.mxu0 %v4309_v26  ;;  %v4510_v18 = vcombine.high %v476_v32, %v480_v38  ;;  %v468_v26 = vld [vmem:[#allocation2 + $0xad8] sm:$0xff] }
 0x1a5   :  { %2949 = vmatpush1.bf16.msra.mxu1 %v4437_v27  ;;  %2907 = vmatprep.subr.bf16.mxu0 %v4302_v28  ;;  %v472_v27 = vld [vmem:[#allocation2 + $0xaf8] sm:$0xff]  ;;  %v4381_v28 = vcombine.low %v348_v63, %v352_v13 }
 0x1a6   :  { %2950 = vmatprep.subr.bf16.mxu1 %v4430_v29  ;;  %v4509_v29 = vcombine.low %v476_v32, %v480_v38  ;;  %v4502_v31 = vcombine.high %v468_v26, %v472_v27  ;;  %v332_v33 = vld [vmem:[#allocation2 + $0x698] sm:$0xff]  ;;  %v4501_v41 = vcombine.low %v468_v26, %v472_v27 }
 0x1a7   :  { %v336_v34 = vld [vmem:[#allocation2 + $0x6b8] sm:$0xff] }
 0x1a8   :  { %2908 = vmatpush1.bf16.msra.mxu0 %v4301_v35  ;;  %v513_v35 = vsub.s32 1, %v5183_v50  ;;  %v4366_v42 = vcombine.high %v332_v33, %v336_v34  ;;  %v324_v44 = vld [vmem:[#allocation2 + $0x658] sm:$0xff]  ;;  %v4365_v51 = vcombine.low %v332_v33, %v336_v34 }
 0x1a9   :  { %2951 = vmatpush1.bf16.msra.mxu1 %v4429_v36  ;;  %2909 = vmatprep.subr.bf16.mxu0 %v4294_v37  ;;  %v460_v36 = vld [vmem:[#allocation2 + $0xa98] sm:$0xff] }
 0x1aa   :  { %2952 = vmatprep.subr.bf16.mxu1 %v4422_v40  ;;  %v464_v37 = vld [vmem:[#allocation2 + $0xab8] sm:$0xff]  ;;  %v4373_v40 = vcombine.low %v340_v20, %v344_v22 }
 0x1ab   :  { %v4494_v43 = vcombine.high %v460_v36, %v464_v37  ;;  %v4493_v53 = vcombine.low %v460_v36, %v464_v37  ;;  %v320_v61 = vld [vmem:[#allocation2 + $0x638] sm:$0xff] }
 0x1ac   :  { %2910 = vmatpush1.bf16.msra.mxu0 %v4293_v45  ;;  %v328_v45 = vld [vmem:[#allocation2 + $0x678] sm:$0xff] }
 0x1ad   :  { %2953 = vmatpush1.bf16.msra.mxu1 %v4421_v46  ;;  %2911 = vmatprep.subr.bf16.mxu0 %v4286_v47  ;;  %v514_v46 = vrot.slane %v5186_v62, %v513_v35  ;;  %v452_v47 = vld [vmem:[#allocation2 + $0xa58] sm:$0xff] }
 0x1ae   :  { %2954 = vmatprep.subr.bf16.mxu1 %v4414_v48  ;;  %v456_v48 = vld [vmem:[#allocation2 + $0xa78] sm:$0xff] }
 0x1af   :  { %v2508_v52 = vadd.f32 %v5203_v58, %v514_v46  ;;  %v2504_v0 = vadd.f32 %v5193_v19, %v514_v46  ;;  %v444_v1 = vld [vmem:[#allocation2 + $0xa18] sm:$0xff]  ;;  %v4485_v58 = vcombine.low %v452_v47, %v456_v48 }
 0x1b0   :  { %2912 = vmatpush1.bf16.msra.mxu0 %v4285_v54  ;;  %v4358_v54 = vcombine.high %v324_v44, %v328_v45  ;;  %v448_v2 = vld [vmem:[#allocation2 + $0xa38] sm:$0xff] }
 0x1b1   :  { %2955 = vmatpush1.bf16.msra.mxu1 %v4413_v55  ;;  %2913 = vmatprep.subr.bf16.mxu0 %v4406_v56  ;;  %v5220_v55 = vpop.f32.mrf.mxu1  ;;  %v4486_v56 = vcombine.high %v452_v47, %v456_v48  ;;  %v4478_v6 = vcombine.high %v444_v1, %v448_v2  ;;  %v2547_v7 = vadd.f32 %v5197_v24, %v2504_v0  ;;  %v4719_v13 = vld [vmem:[#allocation6 + $0x174] ss:$8 sps:$4 sm:$0xff]   ;;  %v4714_v24 = vld [vmem:[#allocation6 + $0x70] ss:$8 sps:$4 sm:$0xff]   ;;  %v4732_v48 = vld [vmem:[#allocation6 + $0x40] ss:$8 sps:$4 sm:$0xff]  }
 0x1b2   :  { %2956 = vmatprep.subr.bf16.mxu1 %v4534_v59  ;;  %v316_v59 = vld [vmem:[#allocation2 + $0x618] sm:$0xff]  ;;  %v4746_v0 = vld [vmem:[#allocation6 + $0x24] ss:$8 sps:$4 sm:$0xff]  }
 0x1b3   :  { %v2632_v23 = vpop.f32.mrf.mxu1  ;;  %v4349_v19 = vcombine.low %v316_v59, %v320_v61  ;;  %v4731_v34 = vld [vmem:[#allocation6 + $0x154] ss:$8 sps:$4 sm:$0xff]  }
 0x1b4   :  { %2914 = vmatpush2.bf16.msra.mxu0 %v4405_v3  ;;  %v2593_v3 = vpop.f32.mrf.mxu0 }
 0x1b5   :  { %2957 = vmatpush2.bf16.msra.mxu1 %v4533_v4  ;;  %2915 = vmatprep.subr.bf16.mxu0 %v4398_v5  ;;  %v4357_v4 = vcombine.low %v324_v44, %v328_v45  ;;  %v2551_v5 = vadd.f32 %v2550_v49, %v2508_v52  ;;  %v5226_v63 = vpop.f32.mrf.mxu1  ;;  %v4737_v45 = vld [vmem:[#allocation6 + $0x144] ss:$8 sps:$4 sm:$0xff]   ;;  %v4735_v49 = vld [vmem:[#allocation6 + $0x140] ss:$8 sps:$4 sm:$0xff]  }
 0x1b6   :  { %2958 = vmatprep.subr.bf16.mxu1 %v4526_v21  ;;  %v4350_v21 = vcombine.high %v316_v59, %v320_v61  ;;  %v4738_v59 = vld [vmem:[#allocation6 + $0x30] ss:$8 sps:$4 sm:$0xff]  }
 0x1b7   :  { %v2594_v8 = vadd.f32 %v2593_v3, %v2551_v5  ;;  %v4741_v61 = vld [vmem:[#allocation6 + $0x130] ss:$8 sps:$4 sm:$0xff]   ;;  %v4747_v3 = vld [vmem:[#allocation6 + $0x120] ss:$8 sps:$4 sm:$0xff]   ;;  %v4755_v5 = vld [vmem:[#allocation6 + $0x114] ss:$8 sps:$4 sm:$0xff]  }
 0x1b8   :  { %2916 = vmatpush2.bf16.msra.mxu0 %v4397_v9  ;;  %v521_v9 = vsub.s32 3, %v5183_v50 }
 0x1b9   :  { %2959 = vmatpush2.bf16.msra.mxu1 %v4525_v10  ;;  %2917 = vmatprep.subr.bf16.mxu0 %v4390_v11  ;;  %v2590_v10 = vadd.f32 %v5208_v57, %v2547_v7  ;;  %v4477_v11 = vcombine.low %v444_v1, %v448_v2  ;;  %v2992_v32 = vmax.f32 %v2594_v8, 0.0  ;;  %v4722_v57 = vld [vmem:[#allocation6 + $0x64] ss:$8 sps:$4 sm:$0xff]   ;;  %v4744_v2 = vld [vmem:[#allocation6 + $0x20] ss:$8 sps:$4 sm:$0xff]  }
 0x1ba   :  { %2960 = vmatprep.subr.bf16.mxu1 %v4518_v12  ;;  %v4716_v12 = vld [vmem:[#allocation6 + $0x74] ss:$8 sps:$4 sm:$0xff]   ;;  %v522_v38 = vrot.slane %v5186_v62, %v521_v9  ;;  %v4720_v62 = vld [vmem:[#allocation6 + $0x60] ss:$8 sps:$4 sm:$0xff]   ;;  %v4749_v1 = vld [vmem:[#allocation6 + $0x124] ss:$8 sps:$4 sm:$0xff]  }
 0x1bb   :  { %v4756_v7 = vld [vmem:[#allocation6] ss:$8 sps:$4 sm:$0xff]   ;;  %v4764_v9 = vld [vmem:[#allocation6 + $0xf4] ss:$8 sps:$4 sm:$0xff]  }
 0x1bc   :  { %2918 = vmatpush2.bf16.msra.mxu0 %v4389_v15  ;;  %v2984_v15 = vmax.f32 %v2590_v10, 0.0  ;;  %v2633_v26 = vadd.f32 %v2632_v23, %v522_v38  ;;  %v4758_v23 = vld [vmem:[#allocation6 + $0x4] ss:$8 sps:$4 sm:$0xff]   ;;  %v4759_v8 = vld [vmem:[#allocation6 + $0x100] ss:$8 sps:$4 sm:$0xff]  }
 0x1bd   :  { %2961 = vmatpush2.bf16.msra.mxu1 %v4517_v16  ;;  %2919 = vmatprep.subr.bf16.mxu0 %v4382_v17  ;;  %v4717_v16 = vld [vmem:[#allocation6 + $0x170] ss:$8 sps:$4 sm:$0xff]   ;;  %v2636_v17 = vpop.f32.mrf.mxu1 }
 0x1be   :  { %2962 = vmatprep.subr.bf16.mxu1 %v4510_v18  ;;  %v4725_v18 = vld [vmem:[#allocation6 + $0x164] ss:$8 sps:$4 sm:$0xff]   ;;  %v3000_v20 = vpack.c.bf16 %v2992_v32, %v2984_v15  ;;  %v4762_v10 = vld [vmem:[#allocation6 + $0xf0] ss:$8 sps:$4 sm:$0xff]   ;;  %v4768_v32 = vld [vmem:[#allocation6 + $0xe0] ss:$8 sps:$4 sm:$0xff]  }
 0x1bf   :  { %v4779_v15 = vld [vmem:[#allocation6 + $0x1d4] ss:$8 sps:$4 sm:$0xff]  }
 0x1c0   :  { %2920 = vmatpush2.bf16.msra.mxu0 %v4381_v28 }
 0x1c1   :  { %2963 = vmatpush2.bf16.msra.mxu1 %v4509_v29  ;;  %2921 = vmatprep.subr.bf16.mxu0 %v4374_v30  ;;  %v4723_v29 = vld [vmem:[#allocation6 + $0x160] ss:$8 sps:$4 sm:$0xff]   ;;  %v4728_v30 = vld [vmem:[#allocation6 + $0x54] ss:$8 sps:$4 sm:$0xff]  }
 0x1c2   :  { %2964 = vmatprep.subr.bf16.mxu1 %v4502_v31 }
 0x1c4   :  { %2922 = vmatpush2.bf16.msra.mxu0 %v4373_v40  ;;  %v4726_v40 = vld [vmem:[#allocation6 + $0x50] ss:$8 sps:$4 sm:$0xff]  }
 0x1c5   :  { %2965 = vmatpush2.bf16.msra.mxu1 %v4501_v41  ;;  %2923 = vmatprep.subr.bf16.mxu0 %v4366_v42  ;;  %v4729_v41 = vld [vmem:[#allocation6 + $0x150] ss:$8 sps:$4 sm:$0xff]   ;;  %v4734_v42 = vld [vmem:[#allocation6 + $0x44] ss:$8 sps:$4 sm:$0xff]  }
 0x1c6   :  { %2966 = vmatprep.subr.bf16.mxu1 %v4494_v43 }
 0x1c8   :  { %2924 = vmatpush2.bf16.msra.mxu0 %v4365_v51  ;;  %v4740_v51 = vld [vmem:[#allocation6 + $0x34] ss:$8 sps:$4 sm:$0xff]  }
 0x1c9   :  { %2967 = vmatpush2.bf16.msra.mxu1 %v4493_v53  ;;  %2925 = vmatprep.subr.bf16.mxu0 %v4358_v54  ;;  %v4743_v54 = vld [vmem:[#allocation6 + $0x134] ss:$8 sps:$4 sm:$0xff]  }
 0x1ca   :  { %2968 = vmatprep.subr.bf16.mxu1 %v4486_v56 }
 0x1cc   :  { %2926 = vmatpush2.bf16.msra.mxu0 %v4357_v4  ;;  %v4752_v4 = vld [vmem:[#allocation6 + $0x14] ss:$8 sps:$4 sm:$0xff]  }
 0x1cd   :  { %2969 = vmatpush2.bf16.msra.mxu1 %v4485_v58  ;;  %2927 = vmatprep.subr.bf16.mxu0 %v4350_v21  ;;  %v4750_v58 = vld [vmem:[#allocation6 + $0x10] ss:$8 sps:$4 sm:$0xff]  }
 0x1ce   :  { %2970 = vmatprep.subr.bf16.mxu1 %v4478_v6  ;;  %v4753_v21 = vld [vmem:[#allocation6 + $0x110] ss:$8 sps:$4 sm:$0xff]   ;;  %v4761_v6 = vld [vmem:[#allocation6 + $0x104] ss:$8 sps:$4 sm:$0xff]  }
 0x1d0   :  { %2928 = vmatpush2.bf16.msra.mxu0 %v4349_v19  ;;  %v4767_v19 = vld [vmem:[#allocation6 + $0x1f4] ss:$8 sps:$4 sm:$0xff]  }
 0x1d1   :  { %2971 = vmatpush2.bf16.msra.mxu1 %v4477_v11  ;;  %3787 = vmatprep.subr.bf16.mxu0 %v4716_v12  ;;  %v4765_v11 = vld [vmem:[#allocation6 + $0x1f0] ss:$8 sps:$4 sm:$0xff]   ;;  %v4770_v12 = vld [vmem:[#allocation6 + $0xe4] ss:$8 sps:$4 sm:$0xff]  }
 0x1d2   :  { %3830 = vmatprep.subr.bf16.mxu1 %v4719_v13  ;;  %v4773_v13 = vld [vmem:[#allocation6 + $0x1e4] ss:$8 sps:$4 sm:$0xff]  }
 0x1d3   :  { %v5229_v22 = vpop.f32.mrf.mxu0  ;;  %2930 = vmatmul.mubr.bf16.vlgmr.msra.gmra.mxu0 %v5159_v25  ;;  %v2637_v25 = vadd.f32 %v2636_v17, %v522_v38  ;;  %v4771_v38 = vld [vmem:[#allocation6 + $0x1e0] ss:$8 sps:$4 sm:$0xff]   ;;  %v4777_v17 = vld [vmem:[#allocation6 + $0x1d0] ss:$8 sps:$4 sm:$0xff]  }
 0x1d4   :  { %v5232_v27 = vpop.f32.mrf.mxu1  ;;  %2973 = vmatmul.mubr.bf16.vlgmr.msra.gmra.mxu1 %v5173_v39  ;;  %3788 = vmatpush1.bf16.msra.mxu0 %v4714_v24  ;;  %v4776_v24 = vld [vmem:[#allocation6 + $0xd4] ss:$8 sps:$4 sm:$0xff]  }
 0x1d5   :  { %3819 = vmatprep.mubr.bf16.mxu0 %v3000_v20  ;;  %3831 = vmatpush1.bf16.msra.mxu1 %v4717_v16  ;;  %v2675_v28 = vpop.f32.mrf.mxu0  ;;  %v4774_v16 = vld [vmem:[#allocation6 + $0xd0] ss:$8 sps:$4 sm:$0xff]   ;;  %v517_v20 = vsub.s32 2, %v5183_v50 }
 0x1d6   :  { %v2676_v31 = vadd.f32 %v2675_v28, %v2633_v26  ;;  %v2718_v33 = vpop.f32.mrf.mxu1  ;;  %3789 = vmatprep.subr.bf16.mxu0 %v4722_v57  ;;  %3832 = vmatprep.subr.bf16.mxu1 %v4725_v18  ;;  %v4782_v57 = vld [vmem:[#allocation6 + $0xc4] ss:$8 sps:$4 sm:$0xff]   ;;  %v4780_v26 = vld [vmem:[#allocation6 + $0xc0] ss:$8 sps:$4 sm:$0xff]   ;;  %v4788_v28 = vld [vmem:[#allocation6 + $0xb4] ss:$8 sps:$4 sm:$0xff]  }
 0x1d7   :  { %v5235_v36 = vpop.f32.mrf.mxu0  ;;  %v4785_v18 = vld [vmem:[#allocation6 + $0x1c4] ss:$8 sps:$4 sm:$0xff]  }
 0x1d8   :  { %v5237_v37 = vpop.f32.mrf.mxu1  ;;  %3790 = vmatpush1.bf16.msra.mxu0 %v4720_v62  ;;  %v2719_v43 = vadd.f32 %v2718_v33, %v2676_v31  ;;  %v4783_v62 = vld [vmem:[#allocation6 + $0x1c0] ss:$8 sps:$4 sm:$0xff]   ;;  %v4786_v33 = vld [vmem:[#allocation6 + $0xb0] ss:$8 sps:$4 sm:$0xff]  }
 0x1d9   :  { %3833 = vmatpush1.bf16.msra.mxu1 %v4723_v29  ;;  %v2679_v39 = vpop.f32.mrf.mxu0  ;;  %3791 = vmatprep.subr.bf16.mxu0 %v4728_v30  ;;  %v4791_v29 = vld [vmem:[#allocation6 + $0x1b4] ss:$8 sps:$4 sm:$0xff]  }
 0x1da   :  { %v2680_v44 = vadd.f32 %v2679_v39, %v2637_v25  ;;  %3834 = vmatprep.subr.bf16.mxu1 %v4731_v34  ;;  %v2722_v46 = vpop.f32.mrf.mxu1  ;;  %v2986_v52 = vmax.f32 %v2719_v43, 0.0  ;;  %v5240_v30 = vld [vmem:[#allocation4] sm:$0xff]  ;;  %v4794_v25 = vld [vmem:[#allocation6 + $0xa4] ss:$8 sps:$4 sm:$0xff]  }
 0x1db   :  { %v518_v31 = vrot.slane %v5240_v30, %v517_v20  ;;  %v4789_v34 = vld [vmem:[#allocation6 + $0x1b0] ss:$8 sps:$4 sm:$0xff]   ;;  %v4800_v43 = vld [vmem:[#allocation6 + $0x94] ss:$8 sps:$4 sm:$0xff]  }
 0x1dc   :  { %v2723_v47 = vadd.f32 %v2722_v46, %v2680_v44  ;;  %3792 = vmatpush1.bf16.msra.mxu0 %v4726_v40  ;;  %v4797_v40 = vld [vmem:[#allocation6 + $0x1a4] ss:$8 sps:$4 sm:$0xff]   ;;  %v4803_v46 = vld [vmem:[#allocation6 + $0x194] ss:$8 sps:$4 sm:$0xff]  }
 0x1dd   :  { %3835 = vmatpush1.bf16.msra.mxu1 %v4729_v41  ;;  %3793 = vmatprep.subr.bf16.mxu0 %v4734_v42  ;;  %v2635_v39 = vadd.f32 %v5226_v63, %v518_v31  ;;  %v4792_v41 = vld [vmem:[#allocation6 + $0xa0] ss:$8 sps:$4 sm:$0xff]   ;;  %v2631_v44 = vadd.f32 %v5220_v55, %v518_v31  ;;  %v4806_v63 = vld [vmem:[#allocation6 + $0x84] ss:$8 sps:$4 sm:$0xff]   ;;  %v4836_v20 = vld [vmem:[#allocation6 + $0x2f4] ss:$8 sps:$4 sm:$0xff]  }
 0x1de   :  { %v2994_v53 = vmax.f32 %v2723_v47, 0.0  ;;  %3836 = vmatprep.subr.bf16.mxu1 %v4737_v45  ;;  %v4795_v42 = vld [vmem:[#allocation6 + $0x1a0] ss:$8 sps:$4 sm:$0xff]   ;;  %v4882_v31 = vld [vmem:[#allocation6 + $0x3f0] ss:$8 sps:$4 sm:$0xff]  }
 0x1df   :  { %v2678_v45 = vadd.f32 %v5235_v36, %v2635_v39  ;;  %v2674_v47 = vadd.f32 %v5229_v22, %v2631_v44  ;;  %v4804_v55 = vld [vmem:[#allocation6 + $0x80] ss:$8 sps:$4 sm:$0xff]   ;;  %v4860_v22 = vld [vmem:[#allocation6 + $0x374] ss:$8 sps:$4 sm:$0xff]   ;;  %v4893_v44 = vld [vmem:[#allocation6 + $0x3c4] ss:$8 sps:$4 sm:$0xff]  }
 0x1e0   :  { %v3002_v56 = vpack.c.bf16 %v2994_v53, %v2986_v52  ;;  %3794 = vmatpush1.bf16.msra.mxu0 %v4732_v48  ;;  %v4798_v48 = vld [vmem:[#allocation6 + $0x90] ss:$8 sps:$4 sm:$0xff]   ;;  %v4809_v52 = vld [vmem:[#allocation6 + $0x184] ss:$8 sps:$4 sm:$0xff]   ;;  %v4807_v36 = vld [vmem:[#allocation6 + $0x180] ss:$8 sps:$4 sm:$0xff]  }
 0x1e1   :  { %3837 = vmatpush1.bf16.msra.mxu1 %v4735_v49  ;;  %3795 = vmatprep.subr.bf16.mxu0 %v4740_v51  ;;  %v4801_v49 = vld [vmem:[#allocation6 + $0x190] ss:$8 sps:$4 sm:$0xff]   ;;  %v2721_v51 = vadd.f32 %v5237_v37, %v2678_v45  ;;  %v2717_v53 = vadd.f32 %v5232_v27, %v2674_v47  ;;  %v4813_v27 = vld [vmem:[#allocation6 + $0x260] ss:$8 sps:$4 sm:$0xff]   ;;  %v4890_v39 = vld [vmem:[#allocation6 + $0x3d4] ss:$8 sps:$4 sm:$0xff]  }
 0x1e2   :  { %3862 = vmatprep.mubr.bf16.mxu1 %v3002_v56  ;;  %3838 = vmatprep.subr.bf16.mxu1 %v4743_v54  ;;  %v4812_v54 = vld [vmem:[#allocation6 + $0x274] ss:$8 sps:$4 sm:$0xff]   ;;  %v4858_v37 = vld [vmem:[#allocation6 + $0x370] ss:$8 sps:$4 sm:$0xff]   ;;  %v4843_v45 = vld [vmem:[#allocation6 + $0x2c0] ss:$8 sps:$4 sm:$0xff]  }
 0x1e3   :  { %v2993_v56 = vmax.f32 %v2721_v51, 0.0  ;;  %v4891_v47 = vld [vmem:[#allocation6 + $0x3c0] ss:$8 sps:$4 sm:$0xff]   ;;  %v4894_v51 = vld [vmem:[#allocation6 + $0x3b0] ss:$8 sps:$4 sm:$0xff]  }
 0x1e4   :  { %3796 = vmatpush1.bf16.msra.mxu0 %v4738_v59  ;;  %v2985_v59 = vmax.f32 %v2717_v53, 0.0  ;;  %v4849_v53 = vld [vmem:[#allocation6 + $0x2a0] ss:$8 sps:$4 sm:$0xff]  }
 0x1e5   :  { %3839 = vmatpush1.bf16.msra.mxu1 %v4741_v61  ;;  %3797 = vmatprep.subr.bf16.mxu0 %v4746_v0  ;;  %v4810_v61 = vld [vmem:[#allocation6 + $0x270] ss:$8 sps:$4 sm:$0xff]   ;;  %v4815_v0 = vld [vmem:[#allocation6 + $0x264] ss:$8 sps:$4 sm:$0xff]  }
 0x1e6   :  { %3840 = vmatprep.subr.bf16.mxu1 %v4749_v1  ;;  %v3001_v1 = vpack.c.bf16 %v2993_v56, %v2985_v59  ;;  %v4902_v56 = vld [vmem:[#allocation6 + $0x394] ss:$8 sps:$4 sm:$0xff]  }
 0x1e8   :  { %3798 = vmatpush1.bf16.msra.mxu0 %v4744_v2  ;;  %v4863_v2 = vld [vmem:[#allocation6 + $0x364] ss:$8 sps:$4 sm:$0xff]  }
 0x1e9   :  { %3841 = vmatpush1.bf16.msra.mxu1 %v4747_v3  ;;  %3799 = vmatprep.subr.bf16.mxu0 %v4752_v4  ;;  %v4818_v3 = vld [vmem:[#allocation6 + $0x254] ss:$8 sps:$4 sm:$0xff]   ;;  %v4861_v4 = vld [vmem:[#allocation6 + $0x360] ss:$8 sps:$4 sm:$0xff]  }
 0x1ea   :  { %3842 = vmatprep.subr.bf16.mxu1 %v4755_v5  ;;  %v4866_v5 = vld [vmem:[#allocation6 + $0x354] ss:$8 sps:$4 sm:$0xff]  }
 0x1ec   :  { %3800 = vmatpush1.bf16.msra.mxu0 %v4750_v58  ;;  %v4816_v58 = vld [vmem:[#allocation6 + $0x250] ss:$8 sps:$4 sm:$0xff]  }
 0x1ed   :  { %3843 = vmatpush1.bf16.msra.mxu1 %v4753_v21  ;;  %3801 = vmatprep.subr.bf16.mxu0 %v4758_v23  ;;  %v4821_v21 = vld [vmem:[#allocation6 + $0x244] ss:$8 sps:$4 sm:$0xff]   ;;  %v4864_v23 = vld [vmem:[#allocation6 + $0x350] ss:$8 sps:$4 sm:$0xff]  }
 0x1ee   :  { %3844 = vmatprep.subr.bf16.mxu1 %v4761_v6  ;;  %v4869_v6 = vld [vmem:[#allocation6 + $0x344] ss:$8 sps:$4 sm:$0xff]  }
 0x1f0   :  { %3802 = vmatpush1.bf16.msra.mxu0 %v4756_v7  ;;  %v4819_v7 = vld [vmem:[#allocation6 + $0x240] ss:$8 sps:$4 sm:$0xff]  }
 0x1f1   :  { %3845 = vmatpush1.bf16.msra.mxu1 %v4759_v8  ;;  %3803 = vmatprep.subr.bf16.mxu0 %v4764_v9  ;;  %v4867_v8 = vld [vmem:[#allocation6 + $0x340] ss:$8 sps:$4 sm:$0xff]   ;;  %v4872_v9 = vld [vmem:[#allocation6 + $0x334] ss:$8 sps:$4 sm:$0xff]  }
 0x1f2   :  { %3846 = vmatprep.subr.bf16.mxu1 %v4767_v19  ;;  %v4822_v19 = vld [vmem:[#allocation6 + $0x230] ss:$8 sps:$4 sm:$0xff]  }
 0x1f4   :  { %3804 = vmatpush2.bf16.msra.mxu0 %v4762_v10  ;;  %v4827_v10 = vld [vmem:[#allocation6 + $0x224] ss:$8 sps:$4 sm:$0xff]  }
 0x1f5   :  { %3847 = vmatpush2.bf16.msra.mxu1 %v4765_v11  ;;  %3805 = vmatprep.subr.bf16.mxu0 %v4770_v12  ;;  %v4870_v11 = vld [vmem:[#allocation6 + $0x330] ss:$8 sps:$4 sm:$0xff]   ;;  %v4875_v12 = vld [vmem:[#allocation6 + $0x324] ss:$8 sps:$4 sm:$0xff]  }
 0x1f6   :  { %3848 = vmatprep.subr.bf16.mxu1 %v4773_v13  ;;  %v4825_v13 = vld [vmem:[#allocation6 + $0x220] ss:$8 sps:$4 sm:$0xff]  }
 0x1f8   :  { %3806 = vmatpush2.bf16.msra.mxu0 %v4768_v32  ;;  %v4830_v32 = vld [vmem:[#allocation6 + $0x214] ss:$8 sps:$4 sm:$0xff]  }
 0x1f9   :  { %3849 = vmatpush2.bf16.msra.mxu1 %v4771_v38  ;;  %3807 = vmatprep.subr.bf16.mxu0 %v4776_v24  ;;  %v4873_v38 = vld [vmem:[#allocation6 + $0x320] ss:$8 sps:$4 sm:$0xff]   ;;  %v4878_v24 = vld [vmem:[#allocation6 + $0x314] ss:$8 sps:$4 sm:$0xff]  }
 0x1fa   :  { %3850 = vmatprep.subr.bf16.mxu1 %v4779_v15  ;;  %v4828_v15 = vld [vmem:[#allocation6 + $0x210] ss:$8 sps:$4 sm:$0xff]  }
 0x1fc   :  { %3808 = vmatpush2.bf16.msra.mxu0 %v4774_v16  ;;  %v4833_v16 = vld [vmem:[#allocation6 + $0x204] ss:$8 sps:$4 sm:$0xff]  }
 0x1fd   :  { %3851 = vmatpush2.bf16.msra.mxu1 %v4777_v17  ;;  %3809 = vmatprep.subr.bf16.mxu0 %v4782_v57  ;;  %v4876_v17 = vld [vmem:[#allocation6 + $0x310] ss:$8 sps:$4 sm:$0xff]   ;;  %v4881_v57 = vld [vmem:[#allocation6 + $0x304] ss:$8 sps:$4 sm:$0xff]  }
 0x1fe   :  { %3852 = vmatprep.subr.bf16.mxu1 %v4785_v18  ;;  %v4831_v18 = vld [vmem:[#allocation6 + $0x200] ss:$8 sps:$4 sm:$0xff]  }
 0x200   :  { %3810 = vmatpush2.bf16.msra.mxu0 %v4780_v26  ;;  %v4879_v26 = vld [vmem:[#allocation6 + $0x300] ss:$8 sps:$4 sm:$0xff]  }
 0x201   :  { %3853 = vmatpush2.bf16.msra.mxu1 %v4783_v62  ;;  %3811 = vmatprep.subr.bf16.mxu0 %v4788_v28  ;;  %v4884_v62 = vld [vmem:[#allocation6 + $0x3f4] ss:$8 sps:$4 sm:$0xff]   ;;  %v4834_v28 = vld [vmem:[#allocation6 + $0x2f0] ss:$8 sps:$4 sm:$0xff]  }
 0x202   :  { %3854 = vmatprep.subr.bf16.mxu1 %v4791_v29  ;;  %v4839_v29 = vld [vmem:[#allocation6 + $0x2e4] ss:$8 sps:$4 sm:$0xff]  }
 0x204   :  { %3812 = vmatpush2.bf16.msra.mxu0 %v4786_v33  ;;  %v4887_v33 = vld [vmem:[#allocation6 + $0x3e4] ss:$8 sps:$4 sm:$0xff]  }
 0x205   :  { %3855 = vmatpush2.bf16.msra.mxu1 %v4789_v34  ;;  %3813 = vmatprep.subr.bf16.mxu0 %v4794_v25  ;;  %v4837_v34 = vld [vmem:[#allocation6 + $0x2e0] ss:$8 sps:$4 sm:$0xff]   ;;  %v4842_v25 = vld [vmem:[#allocation6 + $0x2d4] ss:$8 sps:$4 sm:$0xff]  }
 0x206   :  { %3856 = vmatprep.subr.bf16.mxu1 %v4797_v40  ;;  %v4885_v40 = vld [vmem:[#allocation6 + $0x3e0] ss:$8 sps:$4 sm:$0xff]  }
 0x208   :  { %3814 = vmatpush2.bf16.msra.mxu0 %v4792_v41  ;;  %v4840_v41 = vld [vmem:[#allocation6 + $0x2d0] ss:$8 sps:$4 sm:$0xff]  }
 0x209   :  { %3857 = vmatpush2.bf16.msra.mxu1 %v4795_v42  ;;  %3815 = vmatprep.subr.bf16.mxu0 %v4800_v43  ;;  %v4845_v42 = vld [vmem:[#allocation6 + $0x2c4] ss:$8 sps:$4 sm:$0xff]   ;;  %v4888_v43 = vld [vmem:[#allocation6 + $0x3d0] ss:$8 sps:$4 sm:$0xff]  }
 0x20a   :  { %3858 = vmatprep.subr.bf16.mxu1 %v4803_v46  ;;  %v4848_v46 = vld [vmem:[#allocation6 + $0x2b4] ss:$8 sps:$4 sm:$0xff]  }
 0x20c   :  { %3816 = vmatpush2.bf16.msra.mxu0 %v4798_v48  ;;  %v4896_v48 = vld [vmem:[#allocation6 + $0x3b4] ss:$8 sps:$4 sm:$0xff]  }
 0x20d   :  { %3859 = vmatpush2.bf16.msra.mxu1 %v4801_v49  ;;  %3817 = vmatprep.subr.bf16.mxu0 %v4806_v63  ;;  %v4846_v49 = vld [vmem:[#allocation6 + $0x2b0] ss:$8 sps:$4 sm:$0xff]   ;;  %v4851_v63 = vld [vmem:[#allocation6 + $0x2a4] ss:$8 sps:$4 sm:$0xff]  }
 0x20e   :  { %3860 = vmatprep.subr.bf16.mxu1 %v4809_v52  ;;  %v4899_v52 = vld [vmem:[#allocation6 + $0x3a4] ss:$8 sps:$4 sm:$0xff]  }
 0x210   :  { %3818 = vmatpush2.bf16.msra.mxu0 %v4804_v55 }
 0x211   :  { %3861 = vmatpush2.bf16.msra.mxu1 %v4807_v36  ;;  %3873 = vmatprep.subr.bf16.mxu0 %v4812_v54  ;;  %v4854_v36 = vld [vmem:[#allocation6 + $0x294] ss:$8 sps:$4 sm:$0xff]   ;;  %v4897_v54 = vld [vmem:[#allocation6 + $0x3a0] ss:$8 sps:$4 sm:$0xff]  }
 0x212   :  { %3916 = vmatprep.subr.bf16.mxu1 %v4860_v22  ;;  %v4852_v22 = vld [vmem:[#allocation6 + $0x290] ss:$8 sps:$4 sm:$0xff]  }
 0x213   :  { %3820 = vmatmul.mubr.bf16.vlgmr.msra.gmra.mxu0 %v5213_v14  ;;  %v4824_v14 = vld [vmem:[#allocation6 + $0x234] ss:$8 sps:$4 sm:$0xff]   ;;  %v2759_v55 = vpop.f32.mrf.mxu0 }
 0x214   :  { %3863 = vmatmul.mubr.bf16.vlgmr.msra.gmra.mxu1 %v3001_v1  ;;  %3874 = vmatpush1.bf16.msra.mxu0 %v4810_v61  ;;  %v4857_v61 = vld [vmem:[#allocation6 + $0x284] ss:$8 sps:$4 sm:$0xff]  }
 0x215   :  { %3875 = vmatprep.subr.bf16.mxu0 %v4815_v0  ;;  %3917 = vmatpush1.bf16.msra.mxu1 %v4858_v37  ;;  %v2761_v59 = vpop.f32.mrf.mxu0  ;;  %v4900_v0 = vld [vmem:[#allocation6 + $0x390] ss:$8 sps:$4 sm:$0xff]   ;;  %v529_v37 = vsub.s32 5, %v5183_v50  ;;  %v4905_v1 = vld [vmem:[#allocation6 + $0x384] ss:$8 sps:$4 sm:$0xff]  }
 0x216   :  { %3918 = vmatprep.subr.bf16.mxu1 %v4863_v2  ;;  %v525_v2 = vsub.s32 4, %v5183_v50 }
 0x218   :  { %3876 = vmatpush1.bf16.msra.mxu0 %v4813_v27  ;;  %v2802_v27 = vpop.f32.mrf.mxu1 }
 0x219   :  { %3877 = vmatprep.subr.bf16.mxu0 %v4818_v3  ;;  %3919 = vmatpush1.bf16.msra.mxu1 %v4861_v4  ;;  %v4855_v3 = vld [vmem:[#allocation6 + $0x280] ss:$8 sps:$4 sm:$0xff]   ;;  %v2763_v4 = vpop.f32.mrf.mxu0 }
 0x21a   :  { %3920 = vmatprep.subr.bf16.mxu1 %v4866_v5  ;;  %v4903_v5 = vld [vmem:[#allocation6 + $0x380] ss:$8 sps:$4 sm:$0xff]  }
 0x21c   :  { %3878 = vmatpush1.bf16.msra.mxu0 %v4816_v58  ;;  %v530_v58 = vrot.slane %v5240_v30, %v529_v37 }
 0x21d   :  { %3879 = vmatprep.subr.bf16.mxu0 %v4821_v21  ;;  %3921 = vmatpush1.bf16.msra.mxu1 %v4864_v23  ;;  %v526_v21 = vrot.slane %v5240_v30, %v525_v2  ;;  %v2804_v23 = vpop.f32.mrf.mxu1 }
 0x21e   :  { %3922 = vmatprep.subr.bf16.mxu1 %v4869_v6  ;;  %v2765_v6 = vpop.f32.mrf.mxu0 }
 0x220   :  { %3880 = vmatpush1.bf16.msra.mxu0 %v4819_v7  ;;  %v2762_v7 = vadd.f32 %v2761_v59, %v530_v58 }
 0x221   :  { %3881 = vmatprep.subr.bf16.mxu0 %v4824_v14  ;;  %3923 = vmatpush1.bf16.msra.mxu1 %v4867_v8  ;;  %v2764_v14 = vadd.f32 %v2763_v4, %v526_v21  ;;  %v2760_v8 = vadd.f32 %v2759_v55, %v526_v21  ;;  %v4906_v21 = vld [vmem:[#allocation9 + $0x78] sm:$0xff]  }
 0x222   :  { %3924 = vmatprep.subr.bf16.mxu1 %v4872_v9  ;;  %v2806_v9 = vpop.f32.mrf.mxu1 }
 0x224   :  { %3882 = vmatpush1.bf16.msra.mxu0 %v4822_v19 }
 0x225   :  { %3883 = vmatprep.subr.bf16.mxu0 %v4827_v10  ;;  %3925 = vmatpush1.bf16.msra.mxu1 %v4870_v11  ;;  %v2766_v10 = vadd.f32 %v2765_v6, %v530_v58  ;;  %v4908_v6 = vld [vmem:[#allocation9 + $0x70] sm:$0xff]  }
 0x226   :  { %3926 = vmatprep.subr.bf16.mxu1 %v4875_v12  ;;  %v2805_v12 = vadd.f32 %v2804_v23, %v2762_v7  ;;  %v4907_v23 = vld [vmem:[#allocation9 + $0x38] sm:$0xff]   ;;  %v4909_v7 = vld [vmem:[#allocation9 + $0x30] sm:$0xff]  }
 0x228   :  { %3884 = vmatpush1.bf16.msra.mxu0 %v4825_v13  ;;  %v2807_v13 = vadd.f32 %v2806_v9, %v2764_v14  ;;  %v4910_v14 = vld [vmem:[#allocation9 + $0x68] sm:$0xff]   ;;  %v4912_v9 = vld [vmem:[#allocation9 + $0x60] sm:$0xff]  }
 0x229   :  { %3885 = vmatprep.subr.bf16.mxu0 %v4830_v32  ;;  %3927 = vmatpush1.bf16.msra.mxu1 %v4873_v38  ;;  %v2803_v32 = vadd.f32 %v2802_v27, %v2760_v8  ;;  %v2808_v38 = vpop.f32.mrf.mxu1  ;;  %v4911_v8 = vld [vmem:[#allocation9 + $0x28] sm:$0xff]  }
 0x22a   :  { %3928 = vmatprep.subr.bf16.mxu1 %v4878_v24 }
 0x22c   :  { %3886 = vmatpush1.bf16.msra.mxu0 %v4828_v15  ;;  %v2809_v15 = vadd.f32 %v2808_v38, %v2766_v10  ;;  %v4914_v10 = vld [vmem:[#allocation9 + $0x58] sm:$0xff]   ;;  %v4919_v38 = vld [vmem:[#allocation9 + $0x8] sm:$0xff]  }
 0x22d   :  { %3887 = vmatprep.subr.bf16.mxu0 %v4833_v16  ;;  %3929 = vmatpush1.bf16.msra.mxu1 %v4876_v17 }
 0x22e   :  { %3930 = vmatprep.subr.bf16.mxu1 %v4881_v57 }
 0x230   :  { %3888 = vmatpush1.bf16.msra.mxu0 %v4831_v18 }
 0x231   :  { %3889 = vmatprep.subr.bf16.mxu0 %v4836_v20  ;;  %3931 = vmatpush1.bf16.msra.mxu1 %v4879_v26 }
 0x232   :  { %3932 = vmatprep.subr.bf16.mxu1 %v4884_v62 }
 0x234   :  { %3890 = vmatpush2.bf16.msra.mxu0 %v4834_v28 }
 0x235   :  { %3891 = vmatprep.subr.bf16.mxu0 %v4839_v29  ;;  %3933 = vmatpush2.bf16.msra.mxu1 %v4882_v31 }
 0x236   :  { %3934 = vmatprep.subr.bf16.mxu1 %v4887_v33 }
 0x238   :  { %3892 = vmatpush2.bf16.msra.mxu0 %v4837_v34 }
 0x239   :  { %3893 = vmatprep.subr.bf16.mxu0 %v4842_v25  ;;  %3935 = vmatpush2.bf16.msra.mxu1 %v4885_v40  ;;  %v537_v40 = vsub.s32 7, %v5183_v50 }
 0x23a   :  { %3936 = vmatprep.subr.bf16.mxu1 %v4890_v39  ;;  %v533_v39 = vsub.s32 6, %v5183_v50 }
 0x23c   :  { %3894 = vmatpush2.bf16.msra.mxu0 %v4840_v41 }
 0x23d   :  { %3895 = vmatprep.subr.bf16.mxu0 %v4845_v42  ;;  %3937 = vmatpush2.bf16.msra.mxu1 %v4888_v43  ;;  %v538_v42 = vrot.slane %v5240_v30, %v537_v40  ;;  %v534_v43 = vrot.slane %v5240_v30, %v533_v39 }
 0x23e   :  { %3938 = vmatprep.subr.bf16.mxu1 %v4893_v44 }
 0x240   :  { %3896 = vmatpush2.bf16.msra.mxu0 %v4843_v45 }
 0x241   :  { %3897 = vmatprep.subr.bf16.mxu0 %v4848_v46  ;;  %3939 = vmatpush2.bf16.msra.mxu1 %v4891_v47 }
 0x242   :  { %3940 = vmatprep.subr.bf16.mxu1 %v4896_v48 }
 0x244   :  { %3898 = vmatpush2.bf16.msra.mxu0 %v4846_v49 }
 0x245   :  { %3899 = vmatprep.subr.bf16.mxu0 %v4851_v63  ;;  %3941 = vmatpush2.bf16.msra.mxu1 %v4894_v51 }
 0x246   :  { %3942 = vmatprep.subr.bf16.mxu1 %v4899_v52 }
 0x248   :  { %3900 = vmatpush2.bf16.msra.mxu0 %v4849_v53 }
 0x249   :  { %3901 = vmatprep.subr.bf16.mxu0 %v4854_v36  ;;  %3943 = vmatpush2.bf16.msra.mxu1 %v4897_v54 }
 0x24a   :  { %3944 = vmatprep.subr.bf16.mxu1 %v4902_v56 }
 0x24c   :  { %3902 = vmatpush2.bf16.msra.mxu0 %v4852_v22 }
 0x24d   :  { %3903 = vmatprep.subr.bf16.mxu0 %v4857_v61  ;;  %3945 = vmatpush2.bf16.msra.mxu1 %v4900_v0 }
 0x24e   :  { %3946 = vmatprep.subr.bf16.mxu1 %v4905_v1 }
 0x250   :  { %3904 = vmatpush2.bf16.msra.mxu0 %v4855_v3 }
 0x251   :  { %3947 = vmatpush2.bf16.msra.mxu1 %v4903_v5  ;;  %4680 = vmatprep.subr.bf16.mxu0 %v4906_v21 }
 0x253   :  { %v2845_v19 = vpop.f32.mrf.mxu0 }
 0x254   :  { %v2846_v57 = vadd.f32 %v2845_v19, %v2803_v32  ;;  %v2888_v34 = vpop.f32.mrf.mxu1  ;;  %v4913_v19 = vld [vmem:[#allocation9 + $0x20] sm:$0xff]   ;;  %v4918_v32 = vld [vmem:[#allocation9 + $0x48] sm:$0xff]  }
 0x255   :  { %v2847_v11 = vpop.f32.mrf.mxu0  ;;  %v2889_v48 = vadd.f32 %v2888_v34, %v534_v43 }
 0x256   :  { %v2848_v16 = vadd.f32 %v2847_v11, %v2805_v12  ;;  %v2987_v29 = vmax.f32 %v2846_v57, 0.0  ;;  %v2890_v25 = vpop.f32.mrf.mxu1  ;;  %v4915_v11 = vld [vmem:[#allocation9 + $0x18] sm:$0xff]   ;;  %v4916_v12 = vld [vmem:[#allocation9 + $0x50] sm:$0xff]  }
 0x257   :  { %v2849_v24 = vpop.f32.mrf.mxu0  ;;  %v2891_v46 = vadd.f32 %v2890_v25, %v538_v42 }
 0x258   :  { %v2850_v17 = vadd.f32 %v2849_v24, %v2807_v13  ;;  %v2988_v62 = vmax.f32 %v2848_v16, 0.0  ;;  %v2892_v41 = vpop.f32.mrf.mxu1  ;;  %v4917_v13 = vld [vmem:[#allocation9 + $0x10] sm:$0xff]   ;;  %v4920_v24 = vld [vmem:[#allocation9 + $0x40] sm:$0xff]  }
 0x259   :  { %v2851_v18 = vpop.f32.mrf.mxu0  ;;  %v2893_v63 = vadd.f32 %v2892_v41, %v534_v43 }
 0x25a   :  { %v2852_v20 = vadd.f32 %v2851_v18, %v2809_v15  ;;  %v2995_v26 = vmax.f32 %v2850_v17, 0.0  ;;  %v2894_v44 = vpop.f32.mrf.mxu1  ;;  %v4921_v15 = vld [vmem:[#allocation9] sm:$0xff]  }
 0x25b   :  { %v2895_v36 = vadd.f32 %v2894_v44, %v538_v42 }
 0x25c   :  { %v2996_v28 = vmax.f32 %v2852_v20, 0.0  ;;  %v3003_v33 = vpack.c.bf16 %v2995_v26, %v2987_v29 }
 0x25e   :  { %v3004_v31 = vpack.c.bf16 %v2996_v28, %v2988_v62  ;;  %v3135_v28 = vld [vmem:[#allocation7] sm:$0x3] }
 0x25f   :  { %v3144_v29 = vrot.slane %v3135_v28, %v513_v35 }
 0x260   :  { %3905 = vmatprep.mubr.bf16.mxu0 %v3004_v31  ;;  %v3140_v31 = vrot.slane %v3135_v28, %v509_v60 }
 0x261   :  { %3906 = vmatmul.mubr.bf16.vlgmr.msra.gmra.mxu0 %v3003_v33 }
 0x262   :  { %4681 = vmatpush3.bf16.msra.mxu0 %v4907_v23 }
 0x263   :  { %4682 = vmatprep.subr.bf16.mxu0 %v4908_v6 }
 0x266   :  { %4683 = vmatpush3.bf16.msra.mxu0 %v4909_v7 }
 0x267   :  { %4684 = vmatprep.subr.bf16.mxu0 %v4910_v14 }
 0x26a   :  { %4685 = vmatpush3.bf16.msra.mxu0 %v4911_v8 }
 0x26b   :  { %4686 = vmatprep.subr.bf16.mxu0 %v4912_v9 }
 0x26e   :  { %4687 = vmatpush3.bf16.msra.mxu0 %v4913_v19 }
 0x26f   :  { %4688 = vmatprep.subr.bf16.mxu0 %v4914_v10 }
 0x272   :  { %4689 = vmatpush3.bf16.msra.mxu0 %v4915_v11 }
 0x273   :  { %4690 = vmatprep.subr.bf16.mxu0 %v4916_v12 }
 0x276   :  { %4691 = vmatpush3.bf16.msra.mxu0 %v4917_v13 }
 0x277   :  { %4692 = vmatprep.subr.bf16.mxu0 %v4918_v32 }
 0x27a   :  { %4693 = vmatpush3.bf16.msra.mxu0 %v4919_v38 }
 0x27b   :  { %4694 = vmatprep.subr.bf16.mxu0 %v4920_v24 }
 0x27e   :  { %4695 = vmatpush3.bf16.msra.mxu0 %v4921_v15 }
 0x293   :  { %v2931_v45 = vpop.f32.mrf.mxu0 }
 0x294   :  { %v2974_v47 = vpop.f32.mrf.mxu1  ;;  %v2932_v53 = vadd.f32 %v2931_v45, %v2889_v48 }
 0x295   :  { %v2933_v49 = vpop.f32.mrf.mxu0 }
 0x296   :  { %v2934_v51 = vadd.f32 %v2933_v49, %v2891_v46  ;;  %v2976_v52 = vpop.f32.mrf.mxu1  ;;  %v2975_v37 = vadd.f32 %v2974_v47, %v2932_v53 }
 0x297   :  { %v2935_v55 = vpop.f32.mrf.mxu0 }
 0x298   :  { %v2936_v54 = vadd.f32 %v2935_v55, %v2893_v63  ;;  %v2978_v56 = vpop.f32.mrf.mxu1  ;;  %v2977_v59 = vadd.f32 %v2976_v52, %v2934_v51  ;;  %v2989_v4 = vmax.f32 %v2975_v37, 0.0 }
 0x299   :  { %v2937_v22 = vpop.f32.mrf.mxu0 }
 0x29a   :  { %v2979_v61 = vadd.f32 %v2978_v56, %v2936_v54  ;;  %v2938_v0 = vadd.f32 %v2937_v22, %v2895_v36  ;;  %v2980_v30 = vpop.f32.mrf.mxu1  ;;  %v2990_v27 = vmax.f32 %v2977_v59, 0.0 }
 0x29c   :  { %v2981_v1 = vadd.f32 %v2980_v30, %v2938_v0  ;;  %v2997_v2 = vmax.f32 %v2979_v61, 0.0 }
 0x29e   :  { %v2998_v3 = vmax.f32 %v2981_v1, 0.0  ;;  %v3005_v58 = vpack.c.bf16 %v2997_v2, %v2989_v4  ;;  %v4663_v2 = vld [vmem:[#allocation10] ss:$0 sm:$0xff] }
 0x2a0   :  { %v3006_v5 = vpack.c.bf16 %v2998_v3, %v2990_v27 }
 0x2a2   :  { %3948 = vmatprep.mubr.bf16.mxu1 %v3006_v5 }
 0x2a3   :  { %3949 = vmatmul.mubr.bf16.vlgmr.msra.gmra.mxu1 %v3005_v58 }
 0x2d3   :  { %v3821_v16 = vpop.f32.mrf.mxu0 }
 0x2d4   :  { %v3864_v18 = vpop.f32.mrf.mxu1  ;;  %v3822_v39 = vadd.f32 %v3821_v16, %v3140_v31 }
 0x2d5   :  { %v3823_v17 = vpop.f32.mrf.mxu0 }
 0x2d6   :  { %v3866_v26 = vpop.f32.mrf.mxu1  ;;  %v3824_v25 = vadd.f32 %v3823_v17, %v3144_v29  ;;  %v3865_v47 = vadd.f32 %v3864_v18, %v3822_v39 }
 0x2d7   :  { %v3825_v57 = vpop.f32.mrf.mxu0 }
 0x2d8   :  { %v3868_v33 = vpop.f32.mrf.mxu1  ;;  %v3826_v40 = vadd.f32 %v3825_v57, %v3140_v31  ;;  %v3867_v45 = vadd.f32 %v3866_v26, %v3824_v25 }
 0x2d9   :  { %v3827_v20 = vpop.f32.mrf.mxu0 }
 0x2da   :  { %v3870_v41 = vpop.f32.mrf.mxu1  ;;  %v3828_v43 = vadd.f32 %v3827_v20, %v3144_v29  ;;  %v3869_v46 = vadd.f32 %v3868_v33, %v3826_v40 }
 0x2dc   :  { %v3871_v63 = vadd.f32 %v3870_v41, %v3828_v43 }
 0x321   :  { %v3907_v62 = vpop.f32.mrf.mxu0 }
 0x322   :  { %v3908_v52 = vadd.f32 %v3907_v62, %v3865_v47 }
 0x323   :  { %v3909_v34 = vpop.f32.mrf.mxu0 }
 0x324   :  { %v3910_v51 = vadd.f32 %v3909_v34, %v3867_v45 }
 0x325   :  { %v3911_v42 = vpop.f32.mrf.mxu0 }
 0x326   :  { %v3912_v35 = vadd.f32 %v3911_v42, %v3869_v46 }
 0x327   :  { %v3913_v48 = vpop.f32.mrf.mxu0 }
 0x328   :  { %v3914_v60 = vadd.f32 %v3913_v48, %v3871_v63 }
 0x363   :  { %v3950_v44 = vpop.f32.mrf.mxu1 }
 0x364   :  { %v3951_v36 = vadd.f32 %v3950_v44, %v3908_v52 }
 0x365   :  { %v3952_v49 = vpop.f32.mrf.mxu1 }
 0x366   :  { %v3953_v53 = vadd.f32 %v3952_v49, %v3910_v51  ;;  %v3959_v0 = vmax.f32 %v3951_v36, 0.0 }
 0x367   :  { %v3954_v50 = vpop.f32.mrf.mxu1 }
 0x368   :  { %v3955_v55 = vadd.f32 %v3954_v50, %v3912_v35  ;;  %v3960_v59 = vmax.f32 %v3953_v53, 0.0 }
 0x369   :  { %v3956_v54 = vpop.f32.mrf.mxu1 }
 0x36a   :  { %v3957_v56 = vadd.f32 %v3956_v54, %v3914_v60  ;;  %v3961_v22 = vmax.f32 %v3955_v55, 0.0 }
 0x36c   :  { %v3962_v61 = vmax.f32 %v3957_v56, 0.0  ;;  %v3963_v30 = vpack.c.bf16 %v3961_v22, %v3959_v0 }
 0x36e   :  { %v3964_v37 = vpack.c.bf16 %v3962_v61, %v3960_v59 }
 0x370   :  { %4132 = vmatprep.mubr.bf16.mxu0 %v3964_v37 }
 0x371   :  { %4133 = vmatmul.mubr.bf16.vlgmr.msra.gmra.mxu0 %v3963_v30 }
 0x431   :  { %v4696_v1 = vpop.f32.mrf.mxu0 }
 0x433   :  { %v4697_v27 = vpop.f32.mrf.mxu0 }
 0x434   :  { %v4698_v3 = vadd.f32 %v4697_v27, %v4696_v1 }
 0x435   :  { %v4699_v4 = vpop.f32.mrf.mxu0 }
 0x436   :  { %v4135_v5 = vadd.f32 %v4698_v3, %v4663_v2 }
 0x437   :  { %v4700_v58 = vpop.f32.mrf.mxu0 }
 0x438   :  { %4141 = vst [vmem:[%s5275_s7] sm:$0xff] %v4135_v5  ;;  %v4701_v21 = vadd.f32 %v4700_v58, %v4699_v4 }
 0x43a   :  { %v4138_v23 = vadd.f32 %v4701_v21, %v4663_v2 }
 0x43c   :  { %4142 = vst [vmem:[%s5275_s7 + $0x8] sm:$0xff] %v4138_v23 }
 0x43d   :  { %4147 = vsyncpa [#allocation3], 1 }
 0x43e   :  { %4148 = vsyncpa [#allocation5], 1 }
 0x43f   :  { %4149 = vsyncpa [#allocation8], 1 }
 0x440   :  { %4150 = vsyncpa [#allocation11], 1 }

</bundles_post_ra>
